<compile_context>
chip_gen: v7x
topology: tpu7x:2x2x1
jax: 0.10.0
libtpu: 0.0.40
codegen_flags: <defaults>
</compile_context>

<pallas_src>
import functools
import numpy as np
import jax
import jax.numpy as jnp
from jax.experimental import pallas as pl
from jax.experimental.pallas import tpu as pltpu


# ----------------------------------------------------------------------------
# Static (buffer) construction, mirroring the torch __init__ exactly.
# ----------------------------------------------------------------------------
def make_relative_tables(window_size):
    Wh, Ww, Wd = window_size
    rh = np.arange(-(Wh - 1), Wh, dtype=np.float32)
    rw = np.arange(-(Ww - 1), Ww, dtype=np.float32)
    rd = np.arange(-(Wd - 1), Wd, dtype=np.float32)
    table = np.stack(np.meshgrid(rh, rw, rd, indexing="ij"))            # (3, 2Wh-1, 2Ww-1, 2Wd-1)
    table = np.transpose(table, (1, 2, 3, 0))[None].copy()              # (1, ..., 3)
    table[..., 0] /= (Wh - 1)
    table[..., 1] /= (Ww - 1)
    table[..., 2] /= (Wd - 1)
    table *= 8.0
    table = np.sign(table) * np.log2(np.abs(table) + 1.0) / np.log2(8.0)

    coords = np.stack(np.meshgrid(np.arange(Wh), np.arange(Ww), np.arange(Wd), indexing="ij"))
    cf = coords.reshape(3, -1)
    rel = cf[:, :, None] - cf[:, None, :]
    rel = np.transpose(rel, (1, 2, 0)).copy()
    rel[..., 0] += Wh - 1
    rel[..., 1] += Ww - 1
    rel[..., 2] += Wd - 1
    rel[..., 0] *= (2 * Ww - 1) * (2 * Wd - 1)
    rel[..., 1] *= 2 * Wd - 1
    index = rel.sum(-1)                                                 # (N, N)
    return table.astype(np.float32), index.astype(np.int32)


def compute_rel_pos_bias(table, index, w1, b1, w2, num_heads, N):
    """cpb_mlp(table) -> gather -> 16*sigmoid.  Parameter-setup glue (plain JAX)."""
    t = table.reshape(-1, 3)
    h = jax.nn.relu(t @ w1.T + b1)                                      # Linear(3, 512) + ReLU
    bias_table = h @ w2.T                                               # Linear(512, H), no bias
    bias = bias_table[index.reshape(-1)].reshape(N, N, num_heads)
    bias = jnp.transpose(bias, (2, 0, 1))                               # (H, N, N)
    return 16.0 * jax.nn.sigmoid(bias)


# ----------------------------------------------------------------------------
# Pallas kernels: BW windows per grid step.
# ----------------------------------------------------------------------------
_c2 = lambda b: (0, 0)
_c3 = lambda b: (0, 0, 0)


def _attention_core(q, k, v, scale_ref, bias_ref, wp_ref, bp_ref, o_ref, *,
                    num_heads, head_dim, bw, n_tok, compute_dtype, newton):
    """q/k/v: (M, C) f32 accumulators from the QKV projection."""
    C = num_heads * head_dim
    M = bw * n_tok
    f32 = jnp.float32

    q = q.reshape(bw, n_tok, num_heads, head_dim)
    k = k.reshape(bw, n_tok, num_heads, head_dim)
    v = v.reshape(bw, n_tok, num_heads, head_dim)

    # Cosine attention: L2-normalize along head_dim (F.normalize semantics), in f32.
    eps2 = 1e-24                                                        # (1e-12)^2
    qn = q * jax.lax.rsqrt(jnp.maximum(jnp.sum(q * q, axis=-1, keepdims=True), eps2))
    kn = k * jax.lax.rsqrt(jnp.maximum(jnp.sum(k * k, axis=-1, keepdims=True), eps2))

    # Per-head logit scale, pre-expanded in the wrapper to a lane-aligned (1, C)
    # vector: plain last-two-dims broadcast multiply, folded into normalized q.
    qn = qn * scale_ref[...].reshape(1, 1, num_heads, head_dim)

    # (bw, N, H, hd) -> (bw*H, N, hd). Mosaic's dot_general wants the leading-
    # batch 3-D form (the 4-D multi-batch 'bnhd,bmhd->bhnm' contraction does not
    # lower reliably), so the head relayout stays explicit.  Scores stay f32
    # (K = head_dim is tiny) so the clamped logit scale (<=100) does not amplify
    # bf16 rounding of the normalized q/k.
    qh = jnp.transpose(qn, (0, 2, 1, 3)).reshape(bw * num_heads, n_tok, head_dim)
    kh = jnp.transpose(kn, (0, 2, 1, 3)).reshape(bw * num_heads, n_tok, head_dim)
    # v only feeds the p@v matmul in compute_dtype: cast before the relayout so
    # the transpose moves half the bytes on the bf16 path.
    vh = jnp.transpose(v.astype(compute_dtype), (0, 2, 1, 3)).reshape(
        bw * num_heads, n_tok, head_dim)

    attn = jnp.einsum("bnd,bmd->bnm", qh, kh, preferred_element_type=f32)
    attn = attn.reshape(bw, num_heads, n_tok, n_tok) + bias_ref[...][None].astype(f32)
    # TODO(synk): the module's optional shifted-window attention `mask` argument
    # is not wired in; callers using masks need an extra (nW, N, N) input here.

    # Numerically-stable softmax in f32; EUP approx reciprocal. Newton refine
    # only on the f32 compute path (approx error ~2^-12 is already below bf16).
    attn = attn - jnp.max(attn, axis=-1, keepdims=True)
    p = jnp.exp(attn)
    denom = jnp.sum(p, axis=-1, keepdims=True)
    r = pl.reciprocal(denom, approx=True)
    if newton:
        r = r * (2.0 - denom * r)
    p = (p * r).astype(compute_dtype)

    ctx = jnp.einsum("bnm,bmd->bnd",
                     p.reshape(bw * num_heads, n_tok, n_tok), vh,
                     preferred_element_type=f32)                        # (bw*H, N, hd)

    # Heads back to channels (cast before the relayout; the output projection
    # consumes compute_dtype anyway), then a single (M, C) @ (C, C) projection.
    ctx = jnp.transpose(
        ctx.astype(compute_dtype).reshape(bw, num_heads, n_tok, head_dim),
        (0, 2, 1, 3)).reshape(M, C)
    y = jnp.dot(ctx, wp_ref[...], preferred_element_type=f32) + bp_ref[...]
    o_ref[...] = y.reshape(bw, n_tok, C).astype(o_ref.dtype)


def _wsa_kernel_split(x_ref, wq_ref, wk_ref, wv_ref, bq_ref, bv_ref, scale_ref,
                      bias_ref, wp_ref, bp_ref, o_ref, *, num_heads, head_dim,
                      bw, n_tok, compute_dtype, newton):
    """C % 128 != 0: three (M,C)@(C,C) matmuls (no lane-slicing of a 3C output)."""
    C = num_heads * head_dim
    M = bw * n_tok
    x = x_ref[...].reshape(M, C)                    # already compute_dtype (cast in wrapper)
    q = jnp.dot(x, wq_ref[...], preferred_element_type=jnp.float32) + bq_ref[...]
    k = jnp.dot(x, wk_ref[...], preferred_element_type=jnp.float32)    # k has no bias
    v = jnp.dot(x, wv_ref[...], preferred_element_type=jnp.float32) + bv_ref[...]
    _attention_core(q, k, v, scale_ref, bias_ref, wp_ref, bp_ref, o_ref,
                    num_heads=num_heads, head_dim=head_dim, bw=bw, n_tok=n_tok,
                    compute_dtype=compute_dtype, newton=newton)


def _wsa_kernel_fused(x_ref, wqkv_ref, bqkv_ref, scale_ref, bias_ref, wp_ref,
                      bp_ref, o_ref, *, num_heads, head_dim, bw, n_tok,
                      compute_dtype, newton):
    """C % 128 == 0: one fused (M,C)@(C,3C) matmul, 128-aligned lane slices."""
    C = num_heads * head_dim
    M = bw * n_tok
    x = x_ref[...].reshape(M, C)
    qkv = jnp.dot(x, wqkv_ref[...], preferred_element_type=jnp.float32) + bqkv_ref[...]
    q = qkv[:, 0 * C:1 * C]
    k = qkv[:, 1 * C:2 * C]
    v = qkv[:, 2 * C:3 * C]
    _attention_core(q, k, v, scale_ref, bias_ref, wp_ref, bp_ref, o_ref,
                    num_heads=num_heads, head_dim=head_dim, bw=bw, n_tok=n_tok,
                    compute_dtype=compute_dtype, newton=newton)


# ----------------------------------------------------------------------------
# Wrapper
# ----------------------------------------------------------------------------
def window_self_attention(x, params, rel_bias, *, num_heads, block_windows=None,
                          compute_dtype=jnp.bfloat16, out_dtype=None,
                          vmem_limit_bytes=None):
    """x: (B_, N, C) = (num_windows*batch, tokens_per_window, channels)."""
    B_, N, C = x.shape
    head_dim = C // num_heads
    out_dtype = x.dtype if out_dtype is None else out_dtype
    f32 = jnp.float32

    # ---- window-batch (grid) heuristic ------------------------------------
    if block_windows is None:
        target_m = 512                                  # (M,C)@(C,C) projections: M~512 rows
        bw = max(1, min(B_, max(1, target_m // N)))
        softmax_bytes_per_win = 3 * num_heads * N * N * 4  # attn/exp/p f32 temporaries
        bw = min(bw, max(1, (12 << 20) // softmax_bytes_per_win))
        if B_ >= 2:                                     # >=2 grid steps: both v7x TCs get work
            bw = min(bw, -(-B_ // 2))
    else:
        bw = block_windows
    bw = max(1, min(bw, B_))
    n_blocks = -(-B_ // bw)
    B_pad = n_blocks * bw

    # ---- streamed input in compute_dtype (halves x DMA bytes on bf16 path) --
    x_in = x.astype(compute_dtype)
    if B_pad != B_:
        x_in = jnp.pad(x_in, ((0, B_pad - B_), (0, 0), (0, 0)))

    # ---- parameters (resident, constant block index) ------------------------
    wqkv = params["wqkv"]                               # (3C, C), torch layout
    fuse_qkv = (C % 128 == 0)
    if fuse_qkv:
        wqkv_t = wqkv.T.astype(compute_dtype)           # (C, 3C), columns [q | k | v]
        bqkv = jnp.concatenate([params["q_bias"],
                                jnp.zeros_like(params["q_bias"]),
                                params["v_bias"]])[None, :].astype(f32)     # (1, 3C)
        weight_args = (wqkv_t, bqkv)
        weight_specs = [pl.BlockSpec((C, 3 * C), _c2), pl.BlockSpec((1, 3 * C), _c2)]
    else:
        wq_t = wqkv[0 * C:1 * C].T.astype(compute_dtype)
        wk_t = wqkv[1 * C:2 * C].T.astype(compute_dtype)
        wv_t = wqkv[2 * C:3 * C].T.astype(compute_dtype)
        bq = params["q_bias"][None, :].astype(f32)      # (1, C)
        bv = params["v_bias"][None, :].astype(f32)      # (1, C)  (k bias is zero)
        weight_args = (wq_t, wk_t, wv_t, bq, bv)
        weight_specs = ([pl.BlockSpec((C, C), _c2)] * 3
                        + [pl.BlockSpec((1, C), _c2)] * 2)

    wp_t = params["wproj"].T.astype(compute_dtype)      # (C, C)
    bp = params["bproj"][None, :].astype(f32)           # (1, C)

    # clamp(logit_scale, max=log(1/0.01)).exp(), expanded to a lane-aligned (1,C).
    scale_head = jnp.exp(jnp.minimum(params["logit_scale"].reshape(num_heads),
                                     jnp.log(1.0 / 0.01))).astype(f32)
    scale_vec = jnp.repeat(scale_head, head_dim)[None, :]               # (1, C)

    # Relative-position bias: stream in bf16 only when its f32 table is big
    # enough to matter for VMEM (3D windows on v7x); keep f32 for accuracy else.
    bias_f32_bytes = num_heads * N * N * 4
    if jnp.dtype(compute_dtype) == jnp.float32 or bias_f32_bytes <= (2 << 20):
        bias_stream_dtype = jnp.float32
    else:
        bias_stream_dtype = compute_dtype
    rel_bias_in = rel_bias.astype(bias_stream_dtype)                    # (H, N, N)

    # ---- explicit VMEM budget only when the working set is large ------------
    if vmem_limit_bytes is None:
        cb = jnp.dtype(compute_dtype).itemsize
        ob = jnp.dtype(out_dtype).itemsize
        bb = jnp.dtype(bias_stream_dtype).itemsize
        est = (4 * C * C * cb * 2                       # QKV + proj weights, double-buffered
               + num_heads * N * N * bb * 2             # rel-pos bias table
               + bw * N * C * (cb + ob) * 2             # streamed x / out blocks
               + 3 * bw * num_heads * N * N * 4         # softmax f32 temporaries
               + 8 * bw * N * C * 4)                    # q/k/v/ctx temporaries + relayouts
        if est > (24 << 20):
            try:
                cap = int(pltpu.get_tpu_info().vmem_capacity_bytes)
            except Exception:
                cap = 64 << 20                          # safe on v5e/v6e/v7x
            vmem_limit_bytes = max(24 << 20, min(int(est * 3 // 2), cap - (4 << 20)))

    newton = bool(jnp.dtype(compute_dtype) == jnp.float32)
    kern_fn = _wsa_kernel_fused if fuse_qkv else _wsa_kernel_split
    kernel = functools.partial(kern_fn, num_heads=num_heads, head_dim=head_dim,
                               bw=bw, n_tok=N, compute_dtype=compute_dtype,
                               newton=newton)

    out = pl.pallas_call(
        kernel,
        out_shape=jax.ShapeDtypeStruct((B_pad, N, C), out_dtype),
        grid_spec=pltpu.PrefetchScalarGridSpec(
            num_scalar_prefetch=0,
            grid=(n_blocks,),
            in_specs=[pl.BlockSpec((bw, N, C), lambda b: (b, 0, 0))]     # x (compute_dtype)
                     + list(weight_specs)                                # QKV weights/biases
                     + [pl.BlockSpec((1, C), _c2),                       # per-head scale (1, C)
                        pl.BlockSpec((num_heads, N, N), _c3),            # rel-pos bias
                        pl.BlockSpec((C, C), _c2),                       # Wproj^T
                        pl.BlockSpec((1, C), _c2)],                      # proj bias
            out_specs=pl.BlockSpec((bw, N, C), lambda b: (b, 0, 0)),
        ),
        compiler_params=pltpu.CompilerParams(
            dimension_semantics=("parallel",),
            vmem_limit_bytes=vmem_limit_bytes),
    )(x_in, *weight_args, scale_vec, rel_bias_in, wp_t, bp)

    return out[:B_] if B_pad != B_ else out


# ----------------------------------------------------------------------------
# Pure-JAX reference (mirrors the PyTorch forward) for validation.
# ----------------------------------------------------------------------------
def reference(x, params, rel_bias, num_heads):
    B_, N, C = x.shape
    hd = C // num_heads
    qkv_bias = jnp.concatenate([params["q_bias"],
                                jnp.zeros_like(params["v_bias"]),
                                params["v_bias"]])
    qkv = x @ params["wqkv"].T + qkv_bias
    qkv = qkv.reshape(B_, N, 3, num_heads, hd).transpose(2, 0, 3, 1, 4)
    q, k, v = qkv[0], qkv[1], qkv[2]
    qn = q / jnp.maximum(jnp.linalg.norm(q, axis=-1, keepdims=True), 1e-12)
    kn = k / jnp.maximum(jnp.linalg.norm(k, axis=-1, keepdims=True), 1e-12)
    attn = qn @ jnp.swapaxes(kn, -2, -1)
    scale = jnp.exp(jnp.minimum(params["logit_scale"], jnp.log(1.0 / 0.01)))  # (H,1,1)
    attn = attn * scale[None] + rel_bias[None]
    attn = jax.nn.softmax(attn, axis=-1)
    out = (attn @ v).transpose(0, 2, 1, 3).reshape(B_, N, C)
    return out @ params["wproj"].T + params["bproj"]


def _make_params(key, dim, num_heads):
    ks = jax.random.split(key, 8)
    wqkv = 0.1 * jax.random.normal(ks[0], (3 * dim, dim), jnp.float32)       # qkv.weight
    q_bias = 0.1 * jax.random.normal(ks[1], (dim,), jnp.float32)
    v_bias = 0.1 * jax.random.normal(ks[2], (dim,), jnp.float32)
    wproj = 0.1 * jax.random.normal(ks[3], (dim, dim), jnp.float32)          # proj.weight
    bproj = 0.1 * jax.random.normal(ks[4], (dim,), jnp.float32)              # proj.bias
    logit_scale = jnp.log(10.0 * jnp.ones((num_heads, 1, 1), jnp.float32))
    cpb_w1 = 0.1 * jax.random.normal(ks[5], (512, 3), jnp.float32)           # cpb_mlp[0].weight
    cpb_b1 = 0.1 * jax.random.normal(ks[6], (512,), jnp.float32)             # cpb_mlp[0].bias
    cpb_w2 = 0.1 * jax.random.normal(ks[7], (num_heads, 512), jnp.float32)   # cpb_mlp[2].weight
    params = dict(wqkv=wqkv, q_bias=q_bias, v_bias=v_bias, wproj=wproj,
                  bproj=bproj, logit_scale=logit_scale)
    return params, (cpb_w1, cpb_b1, cpb_w2)


if __name__ == "__main__":
    window_size = (2, 2, 2)
    N = window_size[0] * window_size[1] * window_size[2]     # 8 tokens per window
    table_np, index_np = make_relative_tables(window_size)
    table, index = jnp.asarray(table_np), jnp.asarray(index_np)

    key = jax.random.PRNGKey(0)
    k_small, k_big, kx1, kx2 = jax.random.split(key, 4)

    # --- config 1: C % 128 != 0  -> split (three-matmul) QKV path ------------
    dim, num_heads, B_ = 32, 4, 2
    params, (w1, b1, w2) = _make_params(k_small, dim, num_heads)
    rel_bias = compute_rel_pos_bias(table, index, w1, b1, w2, num_heads, N)
    x = jax.random.normal(kx1, (B_, N, dim), jnp.float32)
    ref = jax.block_until_ready(reference(x, params, rel_bias, num_heads))

    out_f32 = jax.block_until_ready(window_self_attention(
        x, params, rel_bias, num_heads=num_heads, compute_dtype=jnp.float32))
    np.testing.assert_allclose(np.asarray(out_f32), np.asarray(ref), rtol=1e-4, atol=1e-4)

    out_bf16 = jax.block_until_ready(window_self_attention(
        x, params, rel_bias, num_heads=num_heads, compute_dtype=jnp.bfloat16))
    np.testing.assert_allclose(np.asarray(out_bf16), np.asarray(ref), rtol=5e-2, atol=1e-1)

    # --- config 2: C % 128 == 0  -> fused (M,C)@(C,3C) QKV path --------------
    dim, num_heads, B_ = 128, 4, 4
    params, (w1, b1, w2) = _make_params(k_big, dim, num_heads)
    rel_bias = compute_rel_pos_bias(table, index, w1, b1, w2, num_heads, N)
    x = jax.random.normal(kx2, (B_, N, dim), jnp.float32)
    ref = jax.block_until_ready(reference(x, params, rel_bias, num_heads))

    out_fused = jax.block_until_ready(window_self_attention(
        x, params, rel_bias, num_heads=num_heads, compute_dtype=jnp.bfloat16))
    np.testing.assert_allclose(np.asarray(out_fused), np.asarray(ref), rtol=5e-2, atol=1e-1)

    print("KERNEL_OK")
</pallas_src>

<mosaic_0001>
module attributes {stable_mosaic.version = 11 : i64} {
  func.func @_wsa_kernel_split(%arg0: i32, %arg1: memref<1x8x32xf32, #tpu.memory_space<vmem>>, %arg2: memref<32x32xf32, #tpu.memory_space<vmem>>, %arg3: memref<32x32xf32, #tpu.memory_space<vmem>>, %arg4: memref<32x32xf32, #tpu.memory_space<vmem>>, %arg5: memref<1x32xf32, #tpu.memory_space<vmem>>, %arg6: memref<1x32xf32, #tpu.memory_space<vmem>>, %arg7: memref<1x32xf32, #tpu.memory_space<vmem>>, %arg8: memref<4x8x8xf32, #tpu.memory_space<vmem>>, %arg9: memref<32x32xf32, #tpu.memory_space<vmem>>, %arg10: memref<1x32xf32, #tpu.memory_space<vmem>>, %arg11: memref<1x8x32xf32, #tpu.memory_space<vmem>>) attributes {dimension_semantics = [#tpu.dimension_semantics<parallel>], iteration_bounds = array<i64: 2>, scalar_prefetch = 0 : i64, scratch_operands = 0 : i64, tpu.core_type = #tpu.core_type<tc>, window_params = [{transform_indices = @transform_0, window_bounds = array<i64: 1, 8, 32>}, {pipeline_mode = #tpu.pipeline_mode<synchronous>, transform_indices = @transform_1, window_bounds = array<i64: 32, 32>}, {pipeline_mode = #tpu.pipeline_mode<synchronous>, transform_indices = @transform_2, window_bounds = array<i64: 32, 32>}, {pipeline_mode = #tpu.pipeline_mode<synchronous>, transform_indices = @transform_3, window_bounds = array<i64: 32, 32>}, {pipeline_mode = #tpu.pipeline_mode<synchronous>, transform_indices = @transform_4, window_bounds = array<i64: 1, 32>}, {pipeline_mode = #tpu.pipeline_mode<synchronous>, transform_indices = @transform_5, window_bounds = array<i64: 1, 32>}, {pipeline_mode = #tpu.pipeline_mode<synchronous>, transform_indices = @transform_6, window_bounds = array<i64: 1, 32>}, {pipeline_mode = #tpu.pipeline_mode<synchronous>, transform_indices = @transform_7, window_bounds = array<i64: 4, 8, 8>}, {pipeline_mode = #tpu.pipeline_mode<synchronous>, transform_indices = @transform_8, window_bounds = array<i64: 32, 32>}, {pipeline_mode = #tpu.pipeline_mode<synchronous>, transform_indices = @transform_9, window_bounds = array<i64: 1, 32>}, {transform_indices = @transform_10, window_bounds = array<i64: 1, 8, 32>}]} {
    %c0 = arith.constant 0 : index
    %c0_0 = arith.constant 0 : index
    %c0_1 = arith.constant 0 : index
    %0 = vector.load %arg1[%c0, %c0_0, %c0_1] : memref<1x8x32xf32, #tpu.memory_space<vmem>>, vector<1x8x32xf32>
    %1 = vector.shape_cast %0 : vector<1x8x32xf32> to vector<8x32xf32>
    %c0_2 = arith.constant 0 : index
    %c0_3 = arith.constant 0 : index
    %2 = vector.load %arg2[%c0_2, %c0_3] : memref<32x32xf32, #tpu.memory_space<vmem>>, vector<32x32xf32>
    %cst = arith.constant dense<0.000000e+00> : vector<8x32xf32>
    %3 = tpu.matmul %1, %2, %cst {dimension_numbers = #tpu.dot_dimension_numbers<[1], [0], [0], [1], [0, 0, 1, 1], [], []>} : vector<8x32xf32>, vector<32x32xf32>, vector<8x32xf32> -> vector<8x32xf32>
    %c0_4 = arith.constant 0 : index
    %c0_5 = arith.constant 0 : index
    %4 = vector.load %arg5[%c0_4, %c0_5] : memref<1x32xf32, #tpu.memory_space<vmem>>, vector<1x32xf32>
    %5 = vector.broadcast %4 : vector<1x32xf32> to vector<8x32xf32>
    %6 = arith.addf %3, %5 : vector<8x32xf32>
    %c0_6 = arith.constant 0 : index
    %c0_7 = arith.constant 0 : index
    %7 = vector.load %arg3[%c0_6, %c0_7] : memref<32x32xf32, #tpu.memory_space<vmem>>, vector<32x32xf32>
    %cst_8 = arith.constant dense<0.000000e+00> : vector<8x32xf32>
    %8 = tpu.matmul %1, %7, %cst_8 {dimension_numbers = #tpu.dot_dimension_numbers<[1], [0], [0], [1], [0, 0, 1, 1], [], []>} : vector<8x32xf32>, vector<32x32xf32>, vector<8x32xf32> -> vector<8x32xf32>
    %c0_9 = arith.constant 0 : index
    %c0_10 = arith.constant 0 : index
    %9 = vector.load %arg4[%c0_9, %c0_10] : memref<32x32xf32, #tpu.memory_space<vmem>>, vector<32x32xf32>
    %cst_11 = arith.constant dense<0.000000e+00> : vector<8x32xf32>
    %10 = tpu.matmul %1, %9, %cst_11 {dimension_numbers = #tpu.dot_dimension_numbers<[1], [0], [0], [1], [0, 0, 1, 1], [], []>} : vector<8x32xf32>, vector<32x32xf32>, vector<8x32xf32> -> vector<8x32xf32>
    %c0_12 = arith.constant 0 : index
    %c0_13 = arith.constant 0 : index
    %11 = vector.load %arg6[%c0_12, %c0_13] : memref<1x32xf32, #tpu.memory_space<vmem>>, vector<1x32xf32>
    %12 = vector.broadcast %11 : vector<1x32xf32> to vector<8x32xf32>
    %13 = arith.addf %10, %12 : vector<8x32xf32>
    %14 = vector.shape_cast %6 : vector<8x32xf32> to vector<1x8x4x8xf32>
    %15 = vector.shape_cast %8 : vector<8x32xf32> to vector<1x8x4x8xf32>
    %16 = vector.shape_cast %13 : vector<8x32xf32> to vector<1x8x4x8xf32>
    %17 = arith.mulf %14, %14 : vector<1x8x4x8xf32>
    %cst_14 = arith.constant dense<0.000000e+00> : vector<1x8x4xf32>
    %18 = vector.multi_reduction <add>, %17, %cst_14 [3] : vector<1x8x4x8xf32> to vector<1x8x4xf32>
    %19 = vector.shape_cast %18 : vector<1x8x4xf32> to vector<1x8x4x1xf32>
    %cst_15 = arith.constant 1.000000e-24 : f32
    %20 = vector.broadcast %cst_15 : f32 to vector<1x8x4x1xf32>
    %21 = arith.maximumf %19, %20 : vector<1x8x4x1xf32>
    %22 = math.rsqrt %21 : vector<1x8x4x1xf32>
    %23 = vector.broadcast %22 : vector<1x8x4x1xf32> to vector<1x8x4x8xf32>
    %24 = arith.mulf %14, %23 : vector<1x8x4x8xf32>
    %25 = arith.mulf %15, %15 : vector<1x8x4x8xf32>
    %cst_16 = arith.constant dense<0.000000e+00> : vector<1x8x4xf32>
    %26 = vector.multi_reduction <add>, %25, %cst_16 [3] : vector<1x8x4x8xf32> to vector<1x8x4xf32>
    %27 = vector.shape_cast %26 : vector<1x8x4xf32> to vector<1x8x4x1xf32>
    %cst_17 = arith.constant 1.000000e-24 : f32
    %28 = vector.broadcast %cst_17 : f32 to vector<1x8x4x1xf32>
    %29 = arith.maximumf %27, %28 : vector<1x8x4x1xf32>
    %30 = math.rsqrt %29 : vector<1x8x4x1xf32>
    %31 = vector.broadcast %30 : vector<1x8x4x1xf32> to vector<1x8x4x8xf32>
    %32 = arith.mulf %15, %31 : vector<1x8x4x8xf32>
    %c0_18 = arith.constant 0 : index
    %c0_19 = arith.constant 0 : index
    %33 = vector.load %arg7[%c0_18, %c0_19] : memref<1x32xf32, #tpu.memory_space<vmem>>, vector<1x32xf32>
    %34 = vector.shape_cast %33 : vector<1x32xf32> to vector<1x1x4x8xf32>
    %35 = vector.broadcast %34 : vector<1x1x4x8xf32> to vector<1x8x4x8xf32>
    %36 = arith.mulf %24, %35 : vector<1x8x4x8xf32>
    %37 = tpu.transpose %36, [0, 2, 1, 3] : vector<1x8x4x8xf32> -> vector<1x4x8x8xf32>
    %38 = vector.shape_cast %37 : vector<1x4x8x8xf32> to vector<4x8x8xf32>
    %39 = tpu.transpose %32, [0, 2, 1, 3] : vector<1x8x4x8xf32> -> vector<1x4x8x8xf32>
    %40 = vector.shape_cast %39 : vector<1x4x8x8xf32> to vector<4x8x8xf32>
    %41 = tpu.transpose %16, [0, 2, 1, 3] : vector<1x8x4x8xf32> -> vector<1x4x8x8xf32>
    %42 = vector.shape_cast %41 : vector<1x4x8x8xf32> to vector<4x8x8xf32>
    "tpu.trace_start"() <{level = 10 : i32, message = "bnd,bmd->bnm"}> : () -> ()
    %cst_20 = arith.constant dense<0.000000e+00> : vector<4x8x8xf32>
    %43 = tpu.matmul %38, %40, %cst_20 {dimension_numbers = #tpu.dot_dimension_numbers<[2], [2], [1], [1], [0, 0, 0, 1, 1, 1], [0], [0]>} : vector<4x8x8xf32>, vector<4x8x8xf32>, vector<4x8x8xf32> -> vector<4x8x8xf32>
    "tpu.trace_stop"() : () -> ()
    %44 = vector.shape_cast %43 : vector<4x8x8xf32> to vector<1x4x8x8xf32>
    %c0_21 = arith.constant 0 : index
    %c0_22 = arith.constant 0 : index
    %c0_23 = arith.constant 0 : index
    %45 = vector.load %arg8[%c0_21, %c0_22, %c0_23] : memref<4x8x8xf32, #tpu.memory_space<vmem>>, vector<4x8x8xf32>
    %46 = vector.shape_cast %45 : vector<4x8x8xf32> to vector<1x4x8x8xf32>
    %47 = arith.addf %44, %46 : vector<1x4x8x8xf32>
    %cst_24 = arith.constant dense<0xFF800000> : vector<1x4x8xf32>
    %48 = vector.multi_reduction <maximumf>, %47, %cst_24 [3] : vector<1x4x8x8xf32> to vector<1x4x8xf32>
    %49 = vector.shape_cast %48 : vector<1x4x8xf32> to vector<1x4x8x1xf32>
    %50 = vector.broadcast %49 : vector<1x4x8x1xf32> to vector<1x4x8x8xf32>
    %51 = arith.subf %47, %50 : vector<1x4x8x8xf32>
    %52 = math.exp %51 : vector<1x4x8x8xf32>
    %cst_25 = arith.constant dense<0.000000e+00> : vector<1x4x8xf32>
    %53 = vector.multi_reduction <add>, %52, %cst_25 [3] : vector<1x4x8x8xf32> to vector<1x4x8xf32>
    %54 = vector.shape_cast %53 : vector<1x4x8xf32> to vector<1x4x8x1xf32>
    %55 = tpu.reciprocal %54 {approx = true} : vector<1x4x8x1xf32> -> vector<1x4x8x1xf32>
    %56 = arith.mulf %54, %55 : vector<1x4x8x1xf32>
    %cst_26 = arith.constant 2.000000e+00 : f32
    %57 = vector.broadcast %cst_26 : f32 to vector<1x4x8x1xf32>
    %58 = arith.subf %57, %56 : vector<1x4x8x1xf32>
    %59 = arith.mulf %55, %58 : vector<1x4x8x1xf32>
    %60 = vector.broadcast %59 : vector<1x4x8x1xf32> to vector<1x4x8x8xf32>
    %61 = arith.mulf %52, %60 : vector<1x4x8x8xf32>
    %62 = vector.shape_cast %61 : vector<1x4x8x8xf32> to vector<4x8x8xf32>
    "tpu.trace_start"() <{level = 10 : i32, message = "bnm,bmd->bnd"}> : () -> ()
    %cst_27 = arith.constant dense<0.000000e+00> : vector<4x8x8xf32>
    %63 = tpu.matmul %62, %42, %cst_27 {dimension_numbers = #tpu.dot_dimension_numbers<[2], [1], [1], [2], [0, 0, 0, 1, 1, 2], [0], [0]>} : vector<4x8x8xf32>, vector<4x8x8xf32>, vector<4x8x8xf32> -> vector<4x8x8xf32>
    "tpu.trace_stop"() : () -> ()
    %64 = vector.shape_cast %63 : vector<4x8x8xf32> to vector<1x4x8x8xf32>
    %65 = tpu.transpose %64, [0, 2, 1, 3] : vector<1x4x8x8xf32> -> vector<1x8x4x8xf32>
    %66 = vector.shape_cast %65 : vector<1x8x4x8xf32> to vector<8x32xf32>
    %c0_28 = arith.constant 0 : index
    %c0_29 = arith.constant 0 : index
    %67 = vector.load %arg9[%c0_28, %c0_29] : memref<32x32xf32, #tpu.memory_space<vmem>>, vector<32x32xf32>
    %cst_30 = arith.constant dense<0.000000e+00> : vector<8x32xf32>
    %68 = tpu.matmul %66, %67, %cst_30 {dimension_numbers = #tpu.dot_dimension_numbers<[1], [0], [0], [1], [0, 0, 1, 1], [], []>} : vector<8x32xf32>, vector<32x32xf32>, vector<8x32xf32> -> vector<8x32xf32>
    %c0_31 = arith.constant 0 : index
    %c0_32 = arith.constant 0 : index
    %69 = vector.load %arg10[%c0_31, %c0_32] : memref<1x32xf32, #tpu.memory_space<vmem>>, vector<1x32xf32>
    %70 = vector.broadcast %69 : vector<1x32xf32> to vector<8x32xf32>
    %71 = arith.addf %68, %70 : vector<8x32xf32>
    %72 = vector.shape_cast %71 : vector<8x32xf32> to vector<1x8x32xf32>
    %c0_33 = arith.constant 0 : index
    %c0_34 = arith.constant 0 : index
    %c0_35 = arith.constant 0 : index
    %73 = vector.load %arg11[%c0_33, %c0_34, %c0_35] : memref<1x8x32xf32, #tpu.memory_space<vmem>>, vector<1x8x32xf32>
    tpu.vector_store %arg11[%c0_33, %c0_34, %c0_35], %72 {strides = array<i32>} : memref<1x8x32xf32, #tpu.memory_space<vmem>>, vector<1x8x32xf32>,
    return
  }
  func.func @transform_0(%arg0: i32) -> (i32, i32, i32) {
    %c0_i32 = arith.constant 0 : i32
    %c0_i32_0 = arith.constant 0 : i32
    %c0_i32_1 = arith.constant 0 : i32
    return %arg0, %c0_i32, %c0_i32_0 : i32, i32, i32
  }
  func.func @transform_1(%arg0: i32) -> (i32, i32) {
    %c0_i32 = arith.constant 0 : i32
    %c0_i32_0 = arith.constant 0 : i32
    %c0_i32_1 = arith.constant 0 : i32
    return %c0_i32, %c0_i32_0 : i32, i32
  }
  func.func @transform_2(%arg0: i32) -> (i32, i32) {
    %c0_i32 = arith.constant 0 : i32
    %c0_i32_0 = arith.constant 0 : i32
    %c0_i32_1 = arith.constant 0 : i32
    return %c0_i32, %c0_i32_0 : i32, i32
  }
  func.func @transform_3(%arg0: i32) -> (i32, i32) {
    %c0_i32 = arith.constant 0 : i32
    %c0_i32_0 = arith.constant 0 : i32
    %c0_i32_1 = arith.constant 0 : i32
    return %c0_i32, %c0_i32_0 : i32, i32
  }
  func.func @transform_4(%arg0: i32) -> (i32, i32) {
    %c0_i32 = arith.constant 0 : i32
    %c0_i32_0 = arith.constant 0 : i32
    %c0_i32_1 = arith.constant 0 : i32
    return %c0_i32, %c0_i32_0 : i32, i32
  }
  func.func @transform_5(%arg0: i32) -> (i32, i32) {
    %c0_i32 = arith.constant 0 : i32
    %c0_i32_0 = arith.constant 0 : i32
    %c0_i32_1 = arith.constant 0 : i32
    return %c0_i32, %c0_i32_0 : i32, i32
  }
  func.func @transform_6(%arg0: i32) -> (i32, i32) {
    %c0_i32 = arith.constant 0 : i32
    %c0_i32_0 = arith.constant 0 : i32
    %c0_i32_1 = arith.constant 0 : i32
    return %c0_i32, %c0_i32_0 : i32, i32
  }
  func.func @transform_7(%arg0: i32) -> (i32, i32, i32) {
    %c0_i32 = arith.constant 0 : i32
    %c0_i32_0 = arith.constant 0 : i32
    %c0_i32_1 = arith.constant 0 : i32
    %c0_i32_2 = arith.constant 0 : i32
    return %c0_i32, %c0_i32_0, %c0_i32_1 : i32, i32, i32
  }
  func.func @transform_8(%arg0: i32) -> (i32, i32) {
    %c0_i32 = arith.constant 0 : i32
    %c0_i32_0 = arith.constant 0 : i32
    %c0_i32_1 = arith.constant 0 : i32
    return %c0_i32, %c0_i32_0 : i32, i32
  }
  func.func @transform_9(%arg0: i32) -> (i32, i32) {
    %c0_i32 = arith.constant 0 : i32
    %c0_i32_0 = arith.constant 0 : i32
    %c0_i32_1 = arith.constant 0 : i32
    return %c0_i32, %c0_i32_0 : i32, i32
  }
  func.func @transform_10(%arg0: i32) -> (i32, i32, i32) {
    %c0_i32 = arith.constant 0 : i32
    %c0_i32_0 = arith.constant 0 : i32
    %c0_i32_1 = arith.constant 0 : i32
    return %arg0, %c0_i32, %c0_i32_0 : i32, i32, i32
  }
}

</mosaic_0001>

<bundles_post_ra>
// kernel: tpu_custom_call.1
= control target key start
LH: loop header
LB: loop body
LE: loop exit
PB: predicated region body
PF: predicated region fallthrough
CT: control target
= control target key end

     0   :  { %s3617_s0 = inlined_call_operand.hbm [shape: f32[2,8,32], index: 0, kind: input, shape index: {}]   ;;  %s3618_s1 = inlined_call_operand.hbm [shape: f32[32,32], index: 1, kind: input, shape index: {}]   ;;  %s3619_s2 = inlined_call_operand.hbm [shape: f32[32,32], index: 2, kind: input, shape index: {}]   ;;  %s3620_s3 = inlined_call_operand.hbm [shape: f32[32,32], index: 3, kind: input, shape index: {}]   ;;  %s3621_s4 = inlined_call_operand.vmem [shape: f32[1,32], index: 4, kind: input, shape index: {}]   ;;  %s3622_s5 = inlined_call_operand.vmem [shape: f32[1,32], index: 5, kind: input, shape index: {}]   ;;  %s3623_s6 = inlined_call_operand.vmem [shape: f32[1,32], index: 6, kind: input, shape index: {}]   ;;  %s3624_s7 = inlined_call_operand.hbm [shape: f32[4,8,8], index: 7, kind: input, shape index: {}]   ;;  %s3625_s8 = inlined_call_operand.hbm [shape: f32[32,32], index: 8, kind: input, shape index: {}]   ;;  %s3626_s9 = inlined_call_operand.vmem [shape: f32[1,32], index: 9, kind: input, shape index: {}]   ;;  %s3627_s10 = inlined_call_operand.hbm [shape: f32[2,8,32], index: 10, kind: output, shape index: {}]  }
   0x1   :  { %3632 = sst [smem:[#allocation19_spill]] %s3618_s1 }
   0x2   :  { %3633 = sst [smem:[#allocation20_spill]] %s3626_s9 }
   0x3   :  { %3634 = sst [smem:[#allocation21_spill]] %s3627_s10 }
   0x4   :  { %15 = vsyncpa [#allocation3], 0 }
   0x5   :  { %17 = vsyncpa [#allocation3 + $0x1], 0 }
   0x6   :  { %18 = vsyncpa [#allocation6], 0 }
   0x7   :  { %19 = vsyncpa [#allocation9], 0 }
   0x8   :  { %20 = vsyncpa [#allocation12], 0 }
   0x9   :  { %21 = vsyncpa [#allocation4], 0 }
   0xa   :  { %23 = vsyncpa [#allocation4 + $0x1], 0  ;;  %s2986_s13 = smov 0   ;;  %s2988_s14 = smov 0  }
   0xb   :  { %s2990_s15 = smov 0   ;;  %s2992_s16 = smov 0  }
   0xc LB: > { %s2910_s17 = smov [#allocation5]   ;;  %s3007_s19 = sadd.s32 4294967295, %s2908_s16   ;;  %s2908_s16 = sphi %s2992_s16, %s3659_s16   ;;  %s2904_s15 = sphi %s2990_s15, %s3658_s15   ;;  %s2900_s14 = sphi %s2988_s14, %s3657_s14   ;;  %s2896_s13 = sphi %s2986_s13, %s3656_s13  }
   0xd   : > { %s287_s18 = sshll.u32 %s2910_s17, 4  ;;  %p2313_p0 = scmp.ge.s32.totalorder %s2908_s16, 1  ;;  %s3012_s18 = int_to_ptr.vmem [resolvable:$true] %s287_s18 }
   0xe   : > { %p3629_p1 = scmp.eq.s32.totalorder %s3007_s19, 0  ;;  %p275_p2 = scmp.lt.s32.totalorder %s2908_s16, 3 }
   0xf   : > { %s2911_s21 = smov [#allocation8]   ;;  %s2912_s24 = smov [#allocation7]  }
  0x10   : > { %p3014_p3 = pnand %p2313_p0, %p275_p2  ;;  %s313_s22 = sshll.u32 %s2911_s21, 4  ;;  %s3027_s22 = int_to_ptr.vmem [resolvable:$true] %s313_s22 }
  0x11   : > { %s300_s25 = sshll.u32 %s2912_s24, 4  ;;  %s3637_s1 = sld [smem:[#allocation19_spill]]  ;;  %s3029_s25 = int_to_ptr.vmem [resolvable:$true] %s300_s25 }
  0x12   : > { %s3635_s20 = scalar_select %p3014_p3, 1, 0 }
  0x13   : > { %p2525_p5 = pneg %p3014_p3 }
  0x15   : > { %p3023_p6 = pnand %p2525_p5, %p3629_p1 }
  0x17   : > { %s2660_s28 = scalar_lea.hbm %s3637_s1, 512  ;;  %p3039_p8 = pneg %p3023_p6 }
  0x18   : > { %p2661_p7 = scmp.ne.s32.totalorder %s3637_s1, %s2660_s28  ;;  %p2667_p11 = scmp.lt.u32.totalorder %s2660_s28, %s3637_s1 }
  0x1a   : > { %p2663_p9 = pnand %p3039_p8, %p2661_p7 }
  0x1c   : > { %p2664_p10 = pneg %p2663_p9 }
  0x1e   : > { %p2669_p12 = pnand %p2667_p11, %p2664_p10 }
  0x20   : > { %2672 = shalt.err (!%p2669_p12)
}
  0x21   : > { %s2673_s21 = scalar_lea.vmem %s3012_s18, 512  ;;  %p2681_p5 = scmp.lt.s32.totalorder %s3012_s18, %s3012_s18 }
  0x22   : > { %p2674_p13 = scmp.ne.s32.totalorder %s3012_s18, %s2673_s21  ;;  %p2682_p4 = scmp.lt.s32.totalorder %s2673_s21, %s2673_s21 }
  0x24   : > { %p2676_p0 = pnand %p2674_p13, %p3039_p8  ;;  %p2683_p7 = por %p2682_p4, %p2681_p5 }
  0x26   : > { %p2677_p2 = pneg %p2676_p0 }
  0x28   : > { %p2684_p9 = pnand %p2683_p7, %p2677_p2 }
  0x2a   : > { %2687 = shalt.err (!%p2684_p9)
}
  0x2b   : > { %s2913_s24 = smov 128   ;;  %s2914_s26 = smov 8  }
  0x2c   : > { %2528 = dma.hbm_to_vmem [thread:$0]  (!%p3023_p6), %s3637_s1, 512, %s3012_s18, [#allocation6], %s2913_s24, %s2913_s24, %s2914_s26  }
  0x2d   : > { %s2688_s12 = scalar_lea.hbm %s3620_s3, 512 }
  0x2e   : > { %p2689_p4 = scmp.ne.s32.totalorder %s3620_s3, %s2688_s12  ;;  %p2695_p12 = scmp.lt.u32.totalorder %s2688_s12, %s3620_s3 }
  0x30   : > { %p2691_p10 = pnand %p2689_p4, %p3039_p8 }
  0x32   : > { %p2692_p11 = pneg %p2691_p10 }
  0x34   : > { %p2697_p13 = pnand %p2695_p12, %p2692_p11 }
  0x36   : > { %2700 = shalt.err (!%p2697_p13)
}
  0x37   : > { %s2701_s18 = scalar_lea.vmem %s3027_s22, 512  ;;  %p2709_p7 = scmp.lt.s32.totalorder %s3027_s22, %s3027_s22 }
  0x38   : > { %p2702_p0 = scmp.ne.s32.totalorder %s3027_s22, %s2701_s18  ;;  %p2710_p9 = scmp.lt.s32.totalorder %s2701_s18, %s2701_s18 }
  0x3a   : > { %p2704_p2 = pnand %p2702_p0, %p3039_p8  ;;  %p2711_p4 = por %p2710_p9, %p2709_p7 }
  0x3c   : > { %p2705_p5 = pneg %p2704_p2 }
  0x3e   : > { %p2712_p10 = pnand %p2711_p4, %p2705_p5 }
  0x40   : > { %2715 = shalt.err (!%p2712_p10)
}
  0x41   : > { %2534 = dma.hbm_to_vmem [thread:$0]  (!%p3023_p6), %s3620_s3, 512, %s3027_s22, [#allocation9], %s2913_s24, %s2913_s24, %s2914_s26  }
  0x42   : > { %s2716_s29 = scalar_lea.hbm %s3619_s2, 512 }
  0x43   : > { %p2717_p11 = scmp.ne.s32.totalorder %s3619_s2, %s2716_s29  ;;  %p2723_p0 = scmp.lt.u32.totalorder %s2716_s29, %s3619_s2 }
  0x45   : > { %p2719_p12 = pnand %p2717_p11, %p3039_p8 }
  0x47   : > { %p2720_p13 = pneg %p2719_p12 }
  0x49   : > { %p2725_p2 = pnand %p2723_p0, %p2720_p13 }
  0x4b   : > { %2728 = shalt.err (!%p2725_p2)
}
  0x4c   : > { %s2729_s22 = scalar_lea.vmem %s3029_s25, 512  ;;  %p2737_p4 = scmp.lt.s32.totalorder %s3029_s25, %s3029_s25 }
  0x4d   : > { %p2730_p5 = scmp.ne.s32.totalorder %s3029_s25, %s2729_s22  ;;  %p2738_p10 = scmp.lt.s32.totalorder %s2729_s22, %s2729_s22 }
  0x4f   : > { %p2732_p7 = pnand %p2730_p5, %p3039_p8  ;;  %p2739_p11 = por %p2738_p10, %p2737_p4 }
  0x51   : > { %p2733_p9 = pneg %p2732_p7 }
  0x53   : > { %p2740_p12 = pnand %p2739_p11, %p2733_p9 }
  0x55   : > { %2743 = shalt.err (!%p2740_p12)
}
  0x56   : > { %2531 = dma.hbm_to_vmem [thread:$0]  (!%p3023_p6), %s3619_s2, 512, %s3029_s25, [#allocation6], %s2913_s24, %s2913_s24, %s2914_s26  }
  0x57   : > { %s2915_s10 = smov [#allocation10]   ;;  %s2916_s28 = smov [#allocation11]  }
  0x58   : > { %s335_s27 = sshll.u32 %s2915_s10, 4  ;;  %s348_s29 = sshll.u32 %s2916_s28, 4  ;;  %s336_s27 = int_to_ptr.vmem [resolvable:$true] %s335_s27  ;;  %s349_s29 = int_to_ptr.vmem [resolvable:$true] %s348_s29 }
  0x59   : > { %s2744_s17 = scalar_lea.hbm %s3624_s7, 512 }
  0x5a   : > { %p2745_p13 = scmp.ne.s32.totalorder %s3624_s7, %s2744_s17  ;;  %p2751_p5 = scmp.lt.u32.totalorder %s2744_s17, %s3624_s7 }
  0x5c   : > { %p2747_p0 = pnand %p2745_p13, %p3039_p8 }
  0x5e   : > { %p2748_p2 = pneg %p2747_p0 }
  0x60   : > { %p2753_p7 = pnand %p2751_p5, %p2748_p2 }
  0x62   : > { %2756 = shalt.err (!%p2753_p7)
}
  0x63   : > { %s2757_s25 = scalar_lea.vmem %s336_s27, 512  ;;  %p2765_p11 = scmp.lt.s32.totalorder %s336_s27, %s336_s27 }
  0x64   : > { %p2758_p9 = scmp.ne.s32.totalorder %s336_s27, %s2757_s25  ;;  %p2766_p12 = scmp.lt.s32.totalorder %s2757_s25, %s2757_s25 }
  0x66   : > { %p2760_p4 = pnand %p2758_p9, %p3039_p8  ;;  %p2767_p1 = por %p2766_p12, %p2765_p11 }
  0x68   : > { %p2761_p10 = pneg %p2760_p4 }
  0x6a   : > { %p2768_p3 = pnand %p2767_p1, %p2761_p10 }
  0x6c   : > { %2771 = shalt.err (!%p2768_p3)
}
  0x6d   : > { %2537 = dma.hbm_to_vmem [thread:$0]  (!%p3023_p6), %s3624_s7, 512, %s336_s27, [#allocation9], %s2913_s24, %s2913_s24, %s2914_s26  }
  0x6e   : > { %s2772_s30 = scalar_lea.hbm %s3625_s8, 512 }
  0x6f   : > { %p2773_p1 = scmp.ne.s32.totalorder %s3625_s8, %s2772_s30  ;;  %p2779_p0 = scmp.lt.u32.totalorder %s2772_s30, %s3625_s8 }
  0x71   : > { %p2775_p3 = pnand %p2773_p1, %p3039_p8 }
  0x73   : > { %p2776_p13 = pneg %p2775_p3 }
  0x75   : > { %p2781_p2 = pnand %p2779_p0, %p2776_p13 }
  0x77   : > { %2784 = shalt.err (!%p2781_p2)
}
  0x78   : > { %s2785_s18 = scalar_lea.vmem %s349_s29, 512  ;;  %p2793_p4 = scmp.lt.s32.totalorder %s349_s29, %s349_s29 }
  0x79   : > { %p2786_p5 = scmp.ne.s32.totalorder %s349_s29, %s2785_s18  ;;  %p2794_p10 = scmp.lt.s32.totalorder %s2785_s18, %s2785_s18 }
  0x7b   : > { %p2788_p7 = pnand %p2786_p5, %p3039_p8  ;;  %p2795_p11 = por %p2794_p10, %p2793_p4 }
  0x7d   : > { %p2789_p9 = pneg %p2788_p7 }
  0x7f   : > { %p2796_p12 = pnand %p2795_p11, %p2789_p9 }
  0x81   : > { %2799 = shalt.err (!%p2796_p12)
}
  0x82   : > { %2540 = dma.hbm_to_vmem [thread:$0]  (!%p3023_p6), %s3625_s8, 512, %s349_s29, [#allocation12], %s2913_s24, %s2913_s24, %s2914_s26  }
  0x83   : > { %s2312_s23 = sadd.s32 4294967294, %s2908_s16   ;;  %s3159_s11 = sadd.s32 1, %s2908_s16  }
  0x84   : > { %s36_s1 = sadd.s32 1, %s2904_s15  ;;  %s33_s9 = ssub.s32 %s2908_s16, %s3159_s11 }
  0x85   : > { %p43_p8 = scmp.ne.s32.totalorder %s2904_s15, %s2900_s14  ;;  %p34_p1 = scmp.eq.s32.totalorder %s33_s9, 0 }
  0x86   : > { %p44_p3 = scmp.eq.s32.totalorder %s2908_s16, 0  ;;  %p49_p13 = scmp.ne.s32.totalorder %s2900_s14, %s2896_s13 }
  0x87   : > { %p262_p0 = scmp.eq.s32.totalorder %s3007_s19, 1  ;;  %p3639_p5 = scmp.eq.s32.totalorder %s3007_s19, 0 }
  0x88   : > { %s3171_s10 = scalar_select %p34_p1, %s2904_s15, %s36_s1  }
  0x89   : > { %p45_p2 = por %p44_p3, %p43_p8  ;;  %p3175_p7 = por %p3639_p5, %p49_p13 }
  0x8a   : > { %p3179_p6 = por %p262_p0, %p43_p8  ;;  %p268_p9 = scmp.eq.s32.totalorder %s2312_s23, 1 }
  0x8b   : > { %p2554_p4 = scmp.lt.s32.totalorder %s2908_s16, 2  ;;  %s365_s26 = sand.u32 1, %s2904_s15  }
  0x8c   : > { %s3641_s24 = scalar_select %p3179_p6, 1, 0 }
  0x8d   : > { %p3185_p10 = por %p268_p9, %p49_p13  ;;  %s2320_s30 = sshll.u32 %s365_s26, 3 }
  0x8e   : > { %s2321_s12 = sshll.u32 %s2908_s16, 7  ;;  %s369_s18 = scalar_lea.vmem [#allocation2], %s2320_s30 }
  0x8f   : > { %s3642_s29 = scalar_select %p3185_p10, 1, 0 }
  0x90   : > { %s3193_s22 = scalar_lea.hbm %s3617_s0, %s2321_s12  ;;  %s376_s27 = sshll.u32 %s369_s18, 4  ;;  %s3199_s27 = int_to_ptr.vmem [resolvable:$true] %s376_s27 }
  0x91   : > { %p3195_p11 = pnand %p2554_p4, %p45_p2  ;;  %s366_s23 = scalar_lea.sflag [#allocation3], %s365_s26 }
  0x92   : > { %s2800_s1 = scalar_lea.hbm %s3193_s22, 128  ;;  %s2805_s12 = scalar_lea.hbm %s3617_s0, 256 }
  0x93   : > { %p2801_p12 = scmp.ne.s32.totalorder %s3193_s22, %s2800_s1  ;;  %p2802_p8 = pneg %p3195_p11 }
  0x94   : > { %p2806_p13 = scmp.lt.u32.totalorder %s3193_s22, %s3617_s0  ;;  %p2807_p0 = scmp.lt.u32.totalorder %s2805_s12, %s2800_s1 }
  0x95   : > { %p2803_p1 = pnand %p2802_p8, %p2801_p12  ;;  %p2809_p5 = scmp.lt.u32.totalorder %s2800_s1, %s3193_s22 }
  0x96   : > { %p2808_p2 = por %p2807_p0, %p2806_p13 }
  0x97   : > { %p2804_p3 = pneg %p2803_p1 }
  0x98   : > { %p2810_p9 = por %p2809_p5, %p2808_p2 }
  0x9a   : > { %p2811_p4 = pnand %p2810_p9, %p2804_p3 }
  0x9c   : > { %2814 = shalt.err (!%p2811_p4)
}
  0x9d   : > { %s2815_s26 = scalar_lea.vmem %s3199_s27, 128  ;;  %s2917_s18 = smov [#allocation2]  }
  0x9e   : > { %p2816_p12 = scmp.ne.s32.totalorder %s3199_s27, %s2815_s26  ;;  %s2820_s9 = sshll.u32 %s2917_s18, 4  ;;  %s2821_s9 = int_to_ptr.vmem [resolvable:$false] %s2820_s9 }
  0x9f   : > { %s2822_s30 = scalar_lea.vmem %s2821_s9, 256  ;;  %p2823_p6 = scmp.lt.s32.totalorder %s3199_s27, %s2821_s9 }
  0xa0   : > { %p2818_p1 = pnand %p2816_p12, %p2802_p8  ;;  %p2824_p13 = scmp.lt.s32.totalorder %s2822_s30, %s2815_s26 }
  0xa2   : > { %p2819_p10 = pneg %p2818_p1  ;;  %p2825_p0 = por %p2824_p13, %p2823_p6 }
  0xa4   : > { %p2826_p2 = pnand %p2825_p0, %p2819_p10 }
  0xa6   : > { %2829 = shalt.err (!%p2826_p2)
}
  0xa7   : > { %2544 = dma.hbm_to_vmem [thread:$0]  (!%p3195_p11), %s3193_s22, 128, %s3199_s27, %s366_s23  }
  0xa8   : > { %p3644_p3 = scmp.ne.s32.totalorder %s3635_s20, 0 }
  0xa9   : > { %s3229_s1 = sand.u32 (!%p3644_p3), 1, %s2900_s14  }
  0xaa   : > { %385 = sbr.rel (%p3644_p3) target bundleno = 1917 (0x77d), region = 60  ;;  %s2323_s12 = sshll.u32 (!%p3644_p3), %s3229_s1, 3 }
  0xab   : > { %s388_s17 = scalar_lea.sflag (!%p3644_p3), [#allocation3], %s3229_s1  ;;  %s3235_s21 = scalar_lea.vmem (!%p3644_p3), [#allocation2], %s2323_s12 }
  0xb1   : > { %2875 = dma.done.wait (%p3175_p7), %s388_s17, 128  }
  0xb2   : > { %2877 = vsyncadd (%p3175_p7), %s388_s17, 4294967168  ;;  %p3645_p6 = scmp.eq.s32.totalorder %s3007_s19, 0 }
  0xb4   : > { %2879 = dma.done.wait (%p3645_p6), [#allocation6], 1024   ;;  %p3646_p10 = pmov %p3645_p6 }
  0xb5   : > { %p3647_p11 = pmov %p3645_p6 }
  0xb6   : > { %2881 = vsyncadd (%p3646_p10), [#allocation6], 4294966272 }
  0xb7   : > { %2883 = dma.done.wait (%p3647_p11), [#allocation9], 1024   ;;  %p3648_p8 = pmov %p3645_p6 }
  0xb8   : > { %p3649_p5 = pmov %p3645_p6 }
  0xb9   : > { %2885 = vsyncadd (%p3648_p8), [#allocation9], 4294966272 }
  0xba   : > { %2887 = dma.done.wait (%p3649_p5), [#allocation12], 512   ;;  %p3650_p9 = pmov %p3649_p5 }
  0xbb   : > { %v2918_v0 = vmov 0.0|0.0   ;;  %vm2919_vm0 = vmmov 0   ;;  %v2920_v1 = vmov 0.0   ;;  %v534_v2 = vld [vmem:[#allocation7] sm:$0xff]  ;;  %v535_v3 = vld [vmem:[#allocation7 + $0x8] sm:$0xff]  ;;  %v536_v7 = vld [vmem:[#allocation7 + $0x10] sm:$0xff]  ;;  %v704_v24 = vlaneseq }
  0xbc   : > { %2889 = vsyncadd (%p3650_p9), [#allocation12], 4294966784  ;;  %2483 = vmatprep.subr.bf16.mxu1 %v2918_v0  ;;  %2477 = vmatprep.subr.bf16.mxu0 %v2918_v0  ;;  %v449_v4 = vld [vmem:[#allocation5] sm:$0xff]  ;;  %v2484_v5 = vpack.c.bf16 %v535_v3, %v534_v2  ;;  %v450_v6 = vld [vmem:[#allocation5 + $0x8] sm:$0xff]  ;;  %vm460_vm1 = vcmask 261120   ;;  %s2921_s22 = smov 104  }
  0xbd   : > { %2412 = vmatprep.mubr.msk.f32.mxu1 %vm2919_vm0, %v2920_v1  ;;  %2401 = vmatprep.mubr.msk.f32.mxu0 %vm2919_vm0, %v2920_v1  ;;  %v537_v8 = vld [vmem:[#allocation7 + $0x18] sm:$0xff]  ;;  %v2478_v9 = vpack.c.bf16 %v450_v6, %v449_v4  ;;  %v451_v10 = vld [vmem:[#allocation5 + $0x10] sm:$0xff]  ;;  %s2922_s27 = smov 120   ;;  %s2923_s25 = smov 112   ;;  %v2924_v22 = vmov 1983009808  }
  0xbe   : > { %v452_v11 = vld [vmem:[#allocation5 + $0x18] sm:$0xff]  ;;  %2485 = vmatpush3.bf16.msra.mxu1 %v2484_v5  ;;  %v2487_v12 = vpack.c.bf16 %v537_v8, %v536_v7  ;;  %v2330_v15 = vld [vmem:[%s3621_s4] ss:$0 sm:$0xff]  ;;  %v702_v23 = vunpack.c.l.s4 %v2924_v22  ;;  %v2925_v25 = vmov 1934713408   ;;  %v3290_v28 = vshrl.u32 %v704_v24, 7 }
  0xbf   : > { %2479 = vmatpush3.bf16.msra.mxu0 %v2478_v9  ;;  %2486 = vmatprep.subr.bf16.mxu1 %v2918_v0  ;;  %v2481_v13 = vpack.c.bf16 %v452_v11, %v451_v10  ;;  %v3262_v14 = vld [vmem:[%s3235_s21] sm:$0xff]  ;;  %v734_v26 = vunpack.c.l.s4 %v2925_v25  ;;  %vm931_vm2 = vcmask 60416   ;;  %vm1281_vm3 = vcmask 64512   ;;  %s2927_s30 = smov 16   ;;  %s2928_s17 = smov 8  }
  0xc0   : > { %2480 = vmatprep.subr.bf16.mxu0 %v2918_v0  ;;  %v3286_v21 = vld [vmem:[%s3623_s6] sm:$0x1]  ;;  %v703_v27 = vunpack.c.0.s8 %v702_v23  ;;  %s2929_s21 = smov 24   ;;  %vm2091_vm4 = vcmask 130048   ;;  %vm2093_vm5 = vcmask 195584   ;;  %s3652_s9 = sld [smem:[#allocation21_spill]] }
  0xc1   : > { %v735_v31 = vunpack.c.0.s8 %v734_v26  ;;  %p3653_p4 = scmp.ne.s32.totalorder %s3641_s24, 0 }
  0xc2   : > { %2488 = vmatpush3.bf16.msra.mxu1 %v2487_v12  ;;  %v3293_v32 = vsub.s32 %v703_v27, %v3290_v28 }
  0xc3   : > { %2482 = vmatpush3.bf16.msra.mxu0 %v2481_v13  ;;  %2426 = vmatprep.subr.mxu1 %v2920_v1  ;;  %v3296_v39 = vsub.s32 %v735_v31, %v3290_v28 }
  0xc4   : > { %2489 = vmatprep.subr.bf16.mxu0 %v2918_v0 }
  0xc5   : > { %2413 = vmatmul.mubr.msk.f32.vlgmr.msra.gmra.mrb[0].mxu1 %vm460_vm1, %v3262_v14 }
  0xc6   : > { %2402 = vmatmul.mubr.msk.f32.vlgmr.msra.gmra.mrb[0].mxu0 %vm460_vm1, %v3262_v14  ;;  %2428 = vmatprep.mubr.msk.f32.mxu1 %vm2919_vm0, %v2920_v1 }
  0xc7   : > { %2423 = vmatprep.mubr.msk.f32.mxu0 %vm2919_vm0, %v2920_v1 }
 0x198   : > { %v604_v16 = vpop.f32.mrb[0].mxu1 }
 0x199   : > { %774 = vrot.lane.b32.xlu1 %v604_v16, %s2921_s22  ;;  %768 = vrot.lane.b32.xlu0 %v604_v16, %s2922_s27  ;;  %v2414_v17 = vpop.f32.mrb[1].mxu1  ;;  %v530_v18 = vpop.f32.mrb[0].mxu0 }
 0x19a   : > { %v531_v19 = vadd.f32 %v2330_v15, %v530_v18  ;;  %v2403_v20 = vpop.f32.mrb[1].mxu0 }
 0x19d   : > { %771 = vrot.lane.b32.xlu0 %v604_v16, %s2923_s25  ;;  %690 = vrot.lane.b32.xlu1 %v531_v19, %s2922_s27 }
 0x1a1   : > { %693 = vrot.lane.b32.xlu0 %v531_v19, %s2923_s25  ;;  %696 = vrot.lane.b32.xlu1 %v531_v19, %s2921_s22 }
 0x1a5   : > { %1038 = vrot.lane.b32.xlu1 %v3286_v21, %s2922_s27 }
 0x20b   : > { %v775_v29 = vpop.permute.xlu1 %774  ;;  %v769_v30 = vpop.permute.xlu0 %768 }
 0x20c   : > { %v793_v33 = vcombine.low %v769_v30, %v775_v29  ;;  %v794_v34 = vcombine.high %v769_v30, %v775_v29 }
 0x20e   : > { %v801_v40 = vrot.slane %v793_v33, %v3293_v32  ;;  %v808_v41 = vrot.slane %v794_v34, %v3293_v32 }
 0x20f   : > { %v772_v35 = vpop.permute.xlu0 %771  ;;  %v691_v36 = vpop.permute.xlu1 %690 }
 0x210   : > { %v777_v37 = vcombine.low %v604_v16, %v772_v35  ;;  %v778_v38 = vcombine.high %v604_v16, %v772_v35 }
 0x212   : > { %v785_v42 = vrot.slane %v777_v37, %v3293_v32  ;;  %v792_v43 = vrot.slane %v778_v38, %v3293_v32 }
 0x213   : > { %v694_v44 = vpop.permute.xlu0 %693  ;;  %v697_v45 = vpop.permute.xlu1 %696 }
 0x214   : > { %v809_v46 = vcombine.low %v785_v42, %v801_v40  ;;  %v810_v47 = vcombine.high %v785_v42, %v801_v40  ;;  %v825_v48 = vcombine.low %v792_v43, %v808_v41  ;;  %v826_v49 = vcombine.high %v792_v43, %v808_v41 }
 0x215   : > { %v699_v50 = vcombine.low %v531_v19, %v694_v44  ;;  %v715_v51 = vcombine.low %v691_v36, %v697_v45  ;;  %v700_v58 = vcombine.high %v531_v19, %v694_v44  ;;  %v716_v61 = vcombine.high %v691_v36, %v697_v45 }
 0x216   : > { %v3303_v52 = vrot.slane %v809_v46, %v3296_v39  ;;  %v3306_v53 = vrot.slane %v825_v48, %v3296_v39  ;;  %v3309_v54 = vrot.slane %v810_v47, %v3296_v39  ;;  %v3312_v55 = vrot.slane %v826_v49, %v3296_v39 }
 0x217   : > { %v707_v56 = vrot.slane %v699_v50, %v3293_v32  ;;  %v723_v57 = vrot.slane %v715_v51, %v3293_v32  ;;  %v714_v7 = vrot.slane %v700_v58, %v3293_v32  ;;  %v730_v8 = vrot.slane %v716_v61, %v3293_v32  ;;  %v609_v58 = vld [vmem:[#allocation8 + $0x8] sm:$0xff]  ;;  %v611_v61 = vld [vmem:[#allocation8 + $0x18] sm:$0xff] }
 0x218   : > { %v980_v59 = vmul.f32 %v3303_v52, %v3303_v52  ;;  %v984_v60 = vmul.f32 %v3306_v53, %v3306_v53  ;;  %v982_v62 = vmul.f32 %v3309_v54, %v3309_v54  ;;  %v986_v63 = vmul.f32 %v3312_v55, %v3312_v55 }
 0x219   : > { %v731_v2 = vcombine.low %v707_v56, %v723_v57  ;;  %v3328_v5 = vcombine.high %v3309_v54, %v2920_v1  ;;  %v3332_v6 = vcombine.high %v3303_v52, %v2920_v1  ;;  %v732_v9 = vcombine.high %v707_v56, %v723_v57  ;;  %v608_v57 = vld [vmem:[#allocation8] sm:$0xff] }
 0x21a   : > { %v988_v3 = vsel %vm931_vm2, %v980_v59, 0.0  ;;  %v1000_v4 = vsel %vm931_vm2, %v984_v60, 0.0  ;;  %v994_v10 = vsel %vm931_vm2, %v982_v62, 0.0  ;;  %v1006_v11 = vsel %vm931_vm2, %v986_v63, 0.0  ;;  %v610_v59 = vld [vmem:[#allocation8 + $0x10] sm:$0xff]  ;;  %v3420_v63 = vpop.permute.xlu1 %1038 }
 0x21b   : > { %989 = vadd.xlane.f32.xlu0 %v988_v3  ;;  %1001 = vadd.xlane.f32.xlu1 %v1000_v4  ;;  %v983_v12 = vmul.f32 %v3328_v5, %v3328_v5  ;;  %v981_v13 = vmul.f32 %v3332_v6, %v3332_v6  ;;  %v3344_v15 = vcombine.high %v3306_v53, %v2920_v1 }
 0x21c   : > { %v3347_v16 = vrot.slane %v731_v2, %v3296_v39  ;;  %v747_v17 = vcombine.low %v714_v7, %v730_v8  ;;  %v3351_v18 = vcombine.high %v3312_v55, %v2920_v1  ;;  %v3354_v19 = vrot.slane %v732_v9, %v3296_v39 }
 0x21d   : > { %v997_v20 = vsel %vm931_vm2, %v983_v12, 0.0  ;;  %v991_v22 = vsel %vm931_vm2, %v981_v13, 0.0  ;;  %v985_v23 = vmul.f32 %v3344_v15, %v3344_v15  ;;  %v748_v25 = vcombine.high %v714_v7, %v730_v8 }
 0x21e   : > { %v923_v24 = vmul.f32 %v3347_v16, %v3347_v16  ;;  %v987_v26 = vmul.f32 %v3351_v18, %v3351_v18  ;;  %v3365_v27 = vrot.slane %v747_v17, %v3296_v39  ;;  %v925_v31 = vmul.f32 %v3354_v19, %v3354_v19 }
 0x21f   : > { %995 = vadd.xlane.f32.xlu0 %v994_v10  ;;  %1007 = vadd.xlane.f32.xlu1 %v1006_v11  ;;  %v1003_v29 = vsel %vm931_vm2, %v985_v23, 0.0  ;;  %v3373_v33 = vcombine.high %v3347_v16, %v2920_v1  ;;  %v3378_v35 = vrot.slane %v748_v25, %v3296_v39  ;;  %v3386_v40 = vcombine.high %v3354_v19, %v2920_v1 }
 0x220   : > { %v932_v30 = vsel %vm931_vm2, %v923_v24, 0.0  ;;  %v927_v34 = vmul.f32 %v3365_v27, %v3365_v27  ;;  %v1009_v36 = vsel %vm931_vm2, %v987_v26, 0.0  ;;  %v938_v37 = vsel %vm931_vm2, %v925_v31, 0.0 }
 0x221   : > { %v924_v38 = vmul.f32 %v3373_v33, %v3373_v33  ;;  %v929_v43 = vmul.f32 %v3378_v35, %v3378_v35  ;;  %v926_v44 = vmul.f32 %v3386_v40, %v3386_v40  ;;  %v3396_v45 = vcombine.high %v3365_v27, %v2920_v1 }
 0x222   : > { %v944_v41 = vsel %vm931_vm2, %v927_v34, 0.0  ;;  %v3404_v49 = vcombine.high %v3378_v35, %v2920_v1  ;;  %v2490_v60 = vpack.c.bf16 %v609_v58, %v608_v57  ;;  %v2493_v62 = vpack.c.bf16 %v611_v61, %v610_v59 }
 0x223   : > { %998 = vadd.xlane.f32.xlu0 %v997_v20  ;;  %992 = vadd.xlane.f32.xlu1 %v991_v22  ;;  %v935_v42 = vsel %vm931_vm2, %v924_v38, 0.0  ;;  %v950_v46 = vsel %vm931_vm2, %v929_v43, 0.0  ;;  %v941_v47 = vsel %vm931_vm2, %v926_v44, 0.0  ;;  %v928_v48 = vmul.f32 %v3396_v45, %v3396_v45 }
 0x224   : > { %v930_v51 = vmul.f32 %v3404_v49, %v3404_v49  ;;  %2491 = vmatpush3.bf16.msra.mxu0 %v2490_v60 }
 0x225   : > { %v947_v50 = vsel %vm931_vm2, %v928_v48, 0.0  ;;  %2492 = vmatprep.subr.bf16.mxu0 %v2918_v0 }
 0x226   : > { %v953_v56 = vsel %vm931_vm2, %v930_v51, 0.0 }
 0x227   : > { %1004 = vadd.xlane.f32.xlu0 %v1003_v29  ;;  %933 = vadd.xlane.f32.xlu1 %v932_v30 }
 0x228   : > { %2494 = vmatpush3.bf16.msra.mxu0 %v2493_v62  ;;  %v2926_v62 = vmov 1966171168  }
 0x229   : > { %2446 = vmatprep.subr.mxu0 %v2920_v1 }
 0x22b   : > { %1010 = vadd.xlane.f32.xlu0 %v1009_v36  ;;  %939 = vadd.xlane.f32.xlu1 %v938_v37 }
 0x22c   : > { %2424 = vmatmul.mubr.msk.f32.vlgmr.msra.gmra.mrb[2].mxu0 %vm460_vm1, %v3262_v14 }
 0x22d   : > { %2448 = vmatprep.mubr.msk.f32.mxu0 %vm2919_vm0, %v2920_v1 }
 0x22f   : > { %945 = vadd.xlane.f32.xlu1 %v944_v41  ;;  %936 = vadd.xlane.f32.xlu0 %v935_v42 }
 0x233   : > { %951 = vadd.xlane.f32.xlu1 %v950_v46  ;;  %942 = vadd.xlane.f32.xlu0 %v941_v47 }
 0x237   : > { %948 = vadd.xlane.f32.xlu0 %v947_v50 }
 0x23b   : > { %954 = vadd.xlane.f32.xlu0 %v953_v56 }
 0x244   : > { %1042 = vrot.lane.b32.xlu1 %v3286_v21, %s2921_s22 }
 0x251   : > { %1040 = vrot.lane.b32.xlu0 %v3286_v21, %s2923_s25 }
 0x2a8   : > { %v990_v2 = vpop.xlane.xlu0 %989  ;;  %v1002_v3 = vpop.xlane.xlu1 %1001 }
 0x2a9   : > { %v1012_v12 = vmax.f32 %v990_v2, 1e-24  ;;  %v1016_v20 = vmax.f32 %v1002_v3, 1e-24  ;;  %v1047_v2 = vunpack.c.l.s4 %v2926_v62 }
 0x2ac   : > { %v996_v4 = vpop.xlane.xlu0 %995  ;;  %v1008_v7 = vpop.xlane.xlu1 %1007 }
 0x2ad   : > { %v1014_v8 = vmax.f32 %v996_v4, 1e-24  ;;  %v1018_v9 = vmax.f32 %v1008_v7, 1e-24 }
 0x2af   : > { %2612 = vrsqrt.f32 %v1014_v8 }
 0x2b0   : > { %v999_v10 = vpop.xlane.xlu0 %998  ;;  %v993_v11 = vpop.xlane.xlu1 %992  ;;  %2614 = vrsqrt.f32 %v1018_v9 }
 0x2b1   : > { %v1015_v13 = vmax.f32 %v999_v10, 1e-24  ;;  %v1013_v17 = vmax.f32 %v993_v11, 1e-24  ;;  %v1048_v10 = vunpack.c.0.s8 %v1047_v2 }
 0x2b3   : > { %2616 = vrsqrt.f32 %v1015_v13 }
 0x2b4   : > { %2618 = vrsqrt.f32 %v1013_v17  ;;  %v1005_v14 = vpop.xlane.xlu0 %1004  ;;  %v934_v22 = vpop.xlane.xlu1 %933 }
 0x2b5   : > { %2620 = vrsqrt.f32 %v1012_v12  ;;  %v1017_v23 = vmax.f32 %v1005_v14, 1e-24  ;;  %v956_v37 = vmax.f32 %v934_v22, 1e-24 }
 0x2b6   : > { %2622 = vrsqrt.f32 %v1016_v20 }
 0x2b7   : > { %2624 = vrsqrt.f32 %v1017_v23  ;;  %v1044_v23 = vcombine.low %v3286_v21, %v3420_v63 }
 0x2b8   : > { %v1011_v24 = vpop.xlane.xlu0 %1010  ;;  %v940_v25 = vpop.xlane.xlu1 %939 }
 0x2b9   : > { %v1019_v26 = vmax.f32 %v1011_v24, 1e-24  ;;  %v2613_v29 = vpop.eup %2612  ;;  %v958_v42 = vmax.f32 %v940_v25, 1e-24 }
 0x2ba   : > { %v2615_v30 = vpop.eup %2614  ;;  %v1030_v48 = vmul.f32 %v2613_v29, %v3309_v54 }
 0x2bb   : > { %2626 = vrsqrt.f32 %v1019_v26  ;;  %v1034_v57 = vmul.f32 %v2615_v30, %v3312_v55 }
 0x2bc   : > { %v937_v31 = vpop.xlane.xlu0 %936  ;;  %v946_v34 = vpop.xlane.xlu1 %945  ;;  %2628 = vrsqrt.f32 %v956_v37 }
 0x2bd   : > { %v2617_v36 = vpop.eup %2616  ;;  %v957_v46 = vmax.f32 %v937_v31, 1e-24  ;;  %v960_v50 = vmax.f32 %v946_v34, 1e-24  ;;  %2630 = vrsqrt.f32 %v958_v42 }
 0x2be   : > { %v2619_v38 = vpop.eup %2618  ;;  %v1031_v41 = vmul.f32 %v2617_v36, %v3328_v5 }
 0x2bf   : > { %v2621_v43 = vpop.eup %2620  ;;  %v1029_v44 = vmul.f32 %v2619_v38, %v3332_v6  ;;  %2632 = vrsqrt.f32 %v957_v46 }
 0x2c0   : > { %v2623_v47 = vpop.eup %2622  ;;  %v943_v51 = vpop.xlane.xlu0 %942  ;;  %v1028_v59 = vmul.f32 %v2621_v43, %v3303_v52  ;;  %2634 = vrsqrt.f32 %v960_v50 }
 0x2c1   : > { %v952_v56 = vpop.xlane.xlu1 %951  ;;  %v959_v58 = vmax.f32 %v943_v51, 1e-24  ;;  %v1153_v60 = vcombine.low %v1029_v44, %v1031_v41  ;;  %v2625_v61 = vpop.eup %2624  ;;  %v1032_v6 = vmul.f32 %v2623_v47, %v3306_v53 }
 0x2c2   : > { %v962_v5 = vmax.f32 %v952_v56, 1e-24  ;;  %v1145_v3 = vcombine.low %v1028_v59, %v1030_v48  ;;  %v1033_v52 = vmul.f32 %v2625_v61, %v3344_v15 }
 0x2c3   : > { %v1161_v7 = vcombine.low %v1032_v6, %v1034_v57  ;;  %2636 = vrsqrt.f32 %v959_v58  ;;  %v3429_v8 = vrot.slane %v1153_v60, %v3293_v32 }
 0x2c4   : > { %v949_v54 = vpop.xlane.xlu0 %948  ;;  %2638 = vrsqrt.f32 %v962_v5  ;;  %v3434_v53 = vrot.slane %v1145_v3, %v3293_v32 }
 0x2c5   : > { %v2627_v4 = vpop.eup %2626  ;;  %v961_v55 = vmax.f32 %v949_v54, 1e-24  ;;  %v1168_v17 = vrot.slane %v1161_v7, %v3293_v32  ;;  %v1043_v14 = vpop.permute.xlu1 %1042 }
 0x2c6   : > { %v1035_v9 = vmul.f32 %v2627_v4, %v3351_v18  ;;  %v1177_v22 = vcombine.low %v3434_v53, %v3429_v8  ;;  %v2629_v15 = vpop.eup %2628  ;;  %v1051_v18 = vsub.s32 %v1048_v10, %v3290_v28 }
 0x2c7   : > { %2640 = vrsqrt.f32 %v961_v55  ;;  %v2631_v24 = vpop.eup %2630  ;;  %v972_v21 = vmul.f32 %v2629_v15, %v3347_v16 }
 0x2c8   : > { %v1169_v11 = vcombine.low %v1033_v52, %v1035_v9  ;;  %v955_v12 = vpop.xlane.xlu0 %954  ;;  %v1185_v34 = vrot.slane %v1177_v22, %v3296_v39  ;;  %v1052_v38 = vrot.slane %v1044_v23, %v1051_v18  ;;  %v974_v63 = vmul.f32 %v2631_v24, %v3354_v19  ;;  %v1586_v24 = vld [vmem:[#allocation10] sm:$0xff] }
 0x2c9   : > { %v963_v13 = vmax.f32 %v955_v12, 1e-24  ;;  %v2633_v29 = vpop.eup %2632  ;;  %v1178_v9 = vcombine.high %v3434_v53, %v3429_v8 }
 0x2ca   : > { %v1176_v20 = vrot.slane %v1169_v11, %v3293_v32  ;;  %v2635_v31 = vpop.eup %2634  ;;  %v973_v46 = vmul.f32 %v2633_v29, %v3373_v33 }
 0x2cb   : > { %2642 = vrsqrt.f32 %v963_v13  ;;  %v976_v50 = vmul.f32 %v2635_v31, %v3365_v27 }
 0x2cc   : > { %v1041_v25 = vpop.permute.xlu0 %1040  ;;  %v1193_v26 = vcombine.low %v1168_v17, %v1176_v20  ;;  %v1194_v55 = vcombine.high %v1168_v17, %v1176_v20  ;;  %v1192_v17 = vrot.slane %v1178_v9, %v3296_v39 }
 0x2cd   : > { %v1045_v30 = vcombine.low %v1041_v25, %v1043_v14  ;;  %v2637_v37 = vpop.eup %2636 }
 0x2ce   : > { %v1201_v36 = vrot.slane %v1193_v26, %v3296_v39  ;;  %v2639_v42 = vpop.eup %2638  ;;  %v975_v47 = vmul.f32 %v2637_v37, %v3386_v40  ;;  %v1208_v13 = vrot.slane %v1194_v55, %v3296_v39 }
 0x2cf   : > { %v1059_v41 = vrot.slane %v1045_v30, %v1051_v18  ;;  %v978_v51 = vmul.f32 %v2639_v42, %v3378_v35  ;;  %v1587_v30 = vld [vmem:[#allocation10 + $0x8] sm:$0xff] }
 0x2d0   : > { %v1209_v28 = vcombine.low %v1185_v34, %v1201_v36  ;;  %v1210_v12 = vcombine.high %v1185_v34, %v1201_v36  ;;  %v1211_v53 = vcombine.low %v1192_v17, %v1208_v13 }
 0x2d1   : > { %v2641_v43 = vpop.eup %2640  ;;  %v1060_v44 = vcombine.low %v1052_v38, %v1059_v41  ;;  %v1588_v38 = vld [vmem:[#allocation10 + $0x10] sm:$0xff] }
 0x2d2   : > { %2427 = vmatpush3.xpose.msk.msra.mxu1 %vm1281_vm3, %v1209_v28  ;;  %v977_v56 = vmul.f32 %v2641_v43, %v3396_v45 }
 0x2d3   : > { %v1067_v48 = vrot.slane %v1060_v44, %v1051_v18  ;;  %2431 = vmatprep.subr.mxu1 %v2920_v1  ;;  %v1212_v18 = vcombine.high %v1192_v17, %v1208_v13  ;;  %v1589_v44 = vld [vmem:[#allocation10 + $0x18] sm:$0xff] }
 0x2d5   : > { %v2643_v57 = vpop.eup %2642  ;;  %v1069_v58 = vmul.f32 %v1067_v48, %v972_v21  ;;  %v1070_v16 = vmul.f32 %v1067_v48, %v973_v46  ;;  %v1071_v59 = vmul.f32 %v1067_v48, %v974_v63  ;;  %v1072_v60 = vmul.f32 %v1067_v48, %v975_v47 }
 0x2d6   : > { %v979_v19 = vmul.f32 %v2643_v57, %v3404_v49  ;;  %v1073_v5 = vmul.f32 %v1067_v48, %v976_v50  ;;  %v1075_v33 = vmul.f32 %v1067_v48, %v978_v51  ;;  %v1074_v62 = vmul.f32 %v1067_v48, %v977_v56 }
 0x2d7   : > { %v1077_v61 = vcombine.low %v1069_v58, %v1071_v59  ;;  %v1085_v40 = vcombine.low %v1070_v16, %v1072_v60 }
 0x2d8   : > { %v1076_v2 = vmul.f32 %v1067_v48, %v979_v19  ;;  %v1093_v6 = vcombine.low %v1073_v5, %v1075_v33 }
 0x2d9   : > { %v1084_v27 = vrot.slane %v1077_v61, %v3293_v32  ;;  %v1092_v35 = vrot.slane %v1085_v40, %v3293_v32 }
 0x2da   : > { %v1101_v3 = vcombine.low %v1074_v62, %v1076_v2  ;;  %v1100_v45 = vrot.slane %v1093_v6, %v3293_v32 }
 0x2db   : > { %v1109_v4 = vcombine.low %v1084_v27, %v1092_v35  ;;  %v1110_v14 = vcombine.high %v1084_v27, %v1092_v35  ;;  %v2333_v35 = vld [vmem:[%s3622_s5] ss:$0 sm:$0xff] }
 0x2dc   : > { %v1108_v54 = vrot.slane %v1101_v3, %v3293_v32 }
 0x2dd   : > { %v1117_v49 = vrot.slane %v1109_v4, %v3296_v39  ;;  %v1124_v22 = vrot.slane %v1110_v14, %v3296_v39 }
 0x2de   : > { %v1125_v7 = vcombine.low %v1100_v45, %v1108_v54  ;;  %v1126_v11 = vcombine.high %v1100_v45, %v1108_v54 }
 0x2e0   : > { %v1133_v52 = vrot.slane %v1125_v7, %v3296_v39  ;;  %v1140_v8 = vrot.slane %v1126_v11, %v3296_v39 }
 0x2e2   : > { %v1141_v10 = vcombine.low %v1117_v49, %v1133_v52  ;;  %v1142_v20 = vcombine.high %v1117_v49, %v1133_v52  ;;  %v1143_v15 = vcombine.low %v1124_v22, %v1140_v8  ;;  %v1144_v23 = vcombine.high %v1124_v22, %v1140_v8 }
 0x2e4   : > { %2429 = vmatmul.mubr.msk.f32.vlgmr.msra.gmra.mrb[2].mxu1 %vm1281_vm3, %v1141_v10 }
 0x2e5   : > { %2432 = vmatpush3.xpose.msk.msra.mxu1 %vm1281_vm3, %v1210_v12  ;;  %2433 = vmatprep.mubr.msk.f32.mxu1 %vm2919_vm0, %v2920_v1 }
 0x2e6   : > { %2436 = vmatprep.subr.mxu1 %v2920_v1 }
 0x2e8   : > { %2434 = vmatmul.mubr.msk.f32.vlgmr.msra.gmra.mrb[4].mxu1 %vm1281_vm3, %v1142_v20 }
 0x2e9   : > { %2437 = vmatpush3.xpose.msk.msra.mxu1 %vm1281_vm3, %v1211_v53  ;;  %2438 = vmatprep.mubr.msk.f32.mxu1 %vm2919_vm0, %v2920_v1 }
 0x2ea   : > { %2441 = vmatprep.subr.mxu1 %v2920_v1 }
 0x2ec   : > { %2439 = vmatmul.mubr.msk.f32.vlgmr.msra.gmra.mrb[6].mxu1 %vm1281_vm3, %v1143_v15 }
 0x2ed   : > { %2442 = vmatpush3.xpose.msk.msra.mxu1 %vm1281_vm3, %v1212_v18  ;;  %2443 = vmatprep.mubr.msk.f32.mxu1 %vm2919_vm0, %v2920_v1 }
 0x2ee   : > { %2451 = vmatprep.subr.mxu1 %v2920_v1 }
 0x2f0   : > { %2444 = vmatmul.mubr.msk.f32.vlgmr.msra.gmra.mrb[8].mxu1 %vm1281_vm3, %v1144_v23 }
 0x2f1   : > { %2453 = vmatprep.mubr.msk.f32.mxu1 %vm2919_vm0, %v2920_v1 }
 0x2ff   : > { %v685_v50 = vpop.f32.mrb[2].mxu0 }
 0x300   : > { %v2425_v51 = vpop.f32.mrb[3].mxu0  ;;  %v686_v3 = vadd.f32 %v2333_v35, %v685_v50 }
 0x3b7   : > { %v1354_v25 = vpop.f32.mrb[2].mxu1 }
 0x3b8   : > { %v1590_v26 = vadd.f32 %v1586_v24, %v1354_v25  ;;  %v2430_v29 = vpop.f32.mrb[3].mxu1 }
 0x3ba   : > { %v1594_v31 = vsel %vm1281_vm3, %v1590_v26, -inf }
 0x3bb   : > { %1595 = vmax.xlane.f32.xlu1 %v1594_v31  ;;  %v1430_v34 = vpop.f32.mrb[4].mxu1 }
 0x3bc   : > { %v1591_v36 = vadd.f32 %v1587_v30, %v1430_v34  ;;  %v2435_v37 = vpop.f32.mrb[5].mxu1 }
 0x3be   : > { %v1597_v41 = vsel %vm1281_vm3, %v1591_v36, -inf }
 0x3bf   : > { %1598 = vmax.xlane.f32.xlu0 %v1597_v41  ;;  %v1506_v42 = vpop.f32.mrb[6].mxu1 }
 0x3c0   : > { %v1592_v28 = vadd.f32 %v1588_v38, %v1506_v42  ;;  %v2440_v43 = vpop.f32.mrb[7].mxu1 }
 0x3c2   : > { %v1600_v21 = vsel %vm1281_vm3, %v1592_v28, -inf }
 0x3c3   : > { %1601 = vmax.xlane.f32.xlu0 %v1600_v21  ;;  %v1582_v63 = vpop.f32.mrb[8].mxu1 }
 0x3c4   : > { %v1593_v46 = vadd.f32 %v1589_v44, %v1582_v63  ;;  %v2445_v47 = vpop.f32.mrb[9].mxu1 }
 0x3c6   : > { %v1603_v48 = vsel %vm1281_vm3, %v1593_v46, -inf }
 0x3c7   : > { %1604 = vmax.xlane.f32.xlu1 %v1603_v48 }
 0x448   : > { %v1596_v56 = vpop.xlane.xlu1 %1595 }
 0x449   : > { %v1606_v57 = vsub.f32 %v1590_v26, %v1596_v56 }
 0x44b   : > { %v1610_v58 = vmul.f32 1.442695, %v1606_v57 }
 0x44c   : > { %v1599_v16 = vpop.xlane.xlu0 %1598 }
 0x44d   : > { %2644 = vpow2.f32 %v1610_v58  ;;  %v1607_v59 = vsub.f32 %v1591_v36, %v1599_v16 }
 0x44f   : > { %v1612_v60 = vmul.f32 1.442695, %v1607_v59 }
 0x450   : > { %v1602_v19 = vpop.xlane.xlu0 %1601 }
 0x451   : > { %2646 = vpow2.f32 %v1612_v60  ;;  %v1608_v5 = vsub.f32 %v1592_v28, %v1602_v19 }
 0x453   : > { %v1614_v33 = vmul.f32 1.442695, %v1608_v5 }
 0x454   : > { %v1605_v45 = vpop.xlane.xlu1 %1604 }
 0x455   : > { %2648 = vpow2.f32 %v1614_v33  ;;  %v1609_v54 = vsub.f32 %v1593_v46, %v1605_v45 }
 0x457   : > { %v3489_v61 = vpop.eup %2644  ;;  %v1616_v4 = vmul.f32 1.442695, %v1609_v54 }
 0x458   : > { %v1618_v40 = vsel %vm1281_vm3, %v3489_v61, 0.0 }
 0x459   : > { %1619 = vadd.xlane.f32.xlu0 %v1618_v40  ;;  %2650 = vpow2.f32 %v1616_v4 }
 0x45b   : > { %v3493_v62 = vpop.eup %2646 }
 0x45c   : > { %v1621_v2 = vsel %vm1281_vm3, %v3493_v62, 0.0 }
 0x45d   : > { %1622 = vadd.xlane.f32.xlu1 %v1621_v2 }
 0x45f   : > { %v3497_v6 = vpop.eup %2648 }
 0x460   : > { %v1624_v27 = vsel %vm1281_vm3, %v3497_v6, 0.0 }
 0x461   : > { %1625 = vadd.xlane.f32.xlu0 %v1624_v27 }
 0x463   : > { %v3506_v7 = vpop.eup %2650 }
 0x464   : > { %v1627_v55 = vsel %vm1281_vm3, %v3506_v7, 0.0 }
 0x46e   : > { %849 = vrot.lane.b32.xlu1 %v686_v3, %s2923_s25  ;;  %s447_s25 = scalar_lea.vmem [#allocation13], %s2323_s12  ;;  %s2930_s12 = smov [#allocation13]  }
 0x46f   : > { %s2194_s23 = sshll.u32 %s447_s25, 4  ;;  %s3574_s23 = int_to_ptr.vmem [resolvable:$true] %s2194_s23 }
 0x477   : > { %846 = vrot.lane.b32.xlu0 %v686_v3, %s2922_s27  ;;  %s2354_s27 = sshll.u32 %s3007_s19, 7  ;;  %s2830_s19 = scalar_lea.vmem %s3574_s23, 128 }
 0x478   : > { %p2831_p7 = scmp.ne.s32.totalorder %s3574_s23, %s2830_s19 }
 0x47a   : > { %p2832_p12 = pnand %p2831_p7, %p3653_p4 }
 0x47c   : > { %p2833_p1 = pneg %p2832_p12 }
 0x492   : > { %1628 = vadd.xlane.f32.xlu1 %v1627_v55 }
 0x4a3   : > { %852 = vrot.lane.b32.xlu1 %v686_v3, %s2921_s22  ;;  %s3651_s22 = sld [smem:[#allocation20_spill]] }
 0x4e6   : > { %v1620_v52 = vpop.xlane.xlu0 %1619 }
 0x4e7   : > { %2652 = vrcp.f32 %v1620_v52 }
 0x4ea   : > { %v1623_v49 = vpop.xlane.xlu1 %1622 }
 0x4eb   : > { %2654 = vrcp.f32 %v1623_v49 }
 0x4ee   : > { %v850_v9 = vpop.permute.xlu1 %849  ;;  %v1626_v10 = vpop.xlane.xlu0 %1625 }
 0x4ef   : > { %2656 = vrcp.f32 %v1626_v10  ;;  %v855_v12 = vcombine.low %v686_v3, %v850_v9  ;;  %v856_v13 = vcombine.high %v686_v3, %v850_v9 }
 0x4f1   : > { %v2653_v53 = vpop.eup %2652  ;;  %v863_v15 = vrot.slane %v855_v12, %v3293_v32  ;;  %v870_v18 = vrot.slane %v856_v13, %v3293_v32 }
 0x4f2   : > { %v847_v14 = vpop.permute.xlu0 %846  ;;  %v1634_v34 = vmul.f32 %v2653_v53, %v1620_v52 }
 0x4f4   : > { %v1638_v46 = vsub.f32 2.0, %v1634_v34 }
 0x4f5   : > { %v2655_v22 = vpop.eup %2654 }
 0x4f6   : > { %v1635_v36 = vmul.f32 %v2655_v22, %v1623_v49  ;;  %v1642_v5 = vmul.f32 %v2653_v53, %v1638_v46 }
 0x4f8   : > { %v1639_v47 = vsub.f32 2.0, %v1635_v36  ;;  %v1646_v55 = vmul.f32 %v3489_v61, %v1642_v5 }
 0x4f9   : > { %v2657_v31 = vpop.eup %2656 }
 0x4fa   : > { %v1636_v48 = vmul.f32 %v2657_v31, %v1626_v10  ;;  %v1643_v33 = vmul.f32 %v2655_v22, %v1639_v47 }
 0x4fc   : > { %v1640_v40 = vsub.f32 2.0, %v1636_v48  ;;  %v1647_v49 = vmul.f32 %v3493_v62, %v1643_v33  ;;  %v2095_v62 = vld [vmem:[#allocation11] sm:$0xff] }
 0x4fe   : > { %v1644_v52 = vmul.f32 %v2657_v31, %v1640_v40 }
 0x500   : > { %v1648_v12 = vmul.f32 %v3497_v6, %v1644_v52  ;;  %v2096_v6 = vld [vmem:[#allocation11 + $0x8] sm:$0xff] }
 0x51f   : > { %v1629_v11 = vpop.xlane.xlu1 %1628 }
 0x520   : > { %2658 = vrcp.f32 %v1629_v11 }
 0x523   : > { %v853_v17 = vpop.permute.xlu1 %852 }
 0x524   : > { %v871_v20 = vcombine.low %v847_v14, %v853_v17  ;;  %v872_v8 = vcombine.high %v847_v14, %v853_v17 }
 0x526   : > { %v879_v23 = vrot.slane %v871_v20, %v3293_v32  ;;  %v886_v24 = vrot.slane %v872_v8, %v3293_v32 }
 0x528   : > { %v887_v25 = vcombine.low %v863_v15, %v879_v23  ;;  %v888_v26 = vcombine.high %v863_v15, %v879_v23  ;;  %v903_v29 = vcombine.low %v870_v18, %v886_v24  ;;  %v904_v30 = vcombine.high %v870_v18, %v886_v24 }
 0x52a   : > { %v2659_v37 = vpop.eup %2658  ;;  %v895_v38 = vrot.slane %v887_v25, %v3296_v39  ;;  %v902_v41 = vrot.slane %v888_v26, %v3296_v39  ;;  %v911_v42 = vrot.slane %v903_v29, %v3296_v39  ;;  %v918_v28 = vrot.slane %v904_v30, %v3296_v39 }
 0x52b   : > { %v1637_v50 = vmul.f32 %v2659_v37, %v1629_v11 }
 0x52c   : > { %v1213_v43 = vcombine.low %v895_v38, %v902_v41  ;;  %v2335_v44 = vcombine.high %v895_v38, %v902_v41  ;;  %v1229_v21 = vcombine.low %v911_v42, %v918_v28  ;;  %v2336_v63 = vcombine.high %v911_v42, %v918_v28  ;;  %v2098_v38 = vld [vmem:[#allocation11 + $0x18] sm:$0xff] }
 0x52d   : > { %v1641_v2 = vsub.f32 2.0, %v1637_v50 }
 0x52e   : > { %v1220_v51 = vrot.slane %v1213_v43, %v3293_v32  ;;  %v1228_v56 = vrot.slane %v2335_v44, %v3293_v32  ;;  %v1236_v57 = vrot.slane %v1229_v21, %v3293_v32  ;;  %v1244_v58 = vrot.slane %v2336_v63, %v3293_v32 }
 0x52f   : > { %v1645_v9 = vmul.f32 %v2659_v37, %v1641_v2  ;;  %v2097_v37 = vld [vmem:[#allocation11 + $0x10] sm:$0xff] }
 0x530   : > { %v1245_v16 = vcombine.low %v1220_v51, %v1228_v56  ;;  %v1261_v59 = vcombine.low %v1236_v57, %v1244_v58  ;;  %v1246_v60 = vcombine.high %v1220_v51, %v1228_v56  ;;  %v1262_v19 = vcombine.high %v1236_v57, %v1244_v58 }
 0x531   : > { %v1649_v61 = vmul.f32 %v3506_v7, %v1645_v9  ;;  %v2496_v7 = vpack.c.bf16 %v2096_v6, %v2095_v62  ;;  %v2499_v44 = vpack.c.bf16 %v2098_v38, %v2097_v37 }
 0x532   : > { %v1253_v27 = vrot.slane %v1245_v16, %v3296_v39  ;;  %v1269_v35 = vrot.slane %v1261_v59, %v3296_v39  ;;  %v1260_v3 = vrot.slane %v1246_v60, %v3296_v39  ;;  %v1276_v45 = vrot.slane %v1262_v19, %v3296_v39 }
 0x534   : > { %v1277_v54 = vcombine.low %v1253_v27, %v1269_v35  ;;  %v1278_v4 = vcombine.high %v1253_v27, %v1269_v35  ;;  %v1279_v10 = vcombine.low %v1260_v3, %v1276_v45  ;;  %v1280_v11 = vcombine.high %v1260_v3, %v1276_v45 }
 0x536   : > { %2447 = vmatpush3.msra.mxu0 %v1277_v54  ;;  %2452 = vmatpush3.msra.mxu1 %v1278_v4 }
 0x537   : > { %2449 = vmatmul.mubr.msk.f32.vlgmr.msra.gmra.mrb[4].mxu0 %vm1281_vm3, %v1646_v55  ;;  %2454 = vmatmul.mubr.msk.f32.vlgmr.msra.gmra.mrb[10].mxu1 %vm1281_vm3, %v1647_v49  ;;  %v2351_v55 = vld [vmem:[%s3651_s22] ss:$0 sm:$0xff] }
 0x538   : > { %2456 = vmatprep.subr.mxu0 %v2920_v1  ;;  %2461 = vmatprep.subr.mxu1 %v2920_v1 }
 0x539   : > { %2457 = vmatpush3.msra.mxu0 %v1279_v10  ;;  %2462 = vmatpush3.msra.mxu1 %v1280_v11 }
 0x53a   : > { %2458 = vmatprep.mubr.msk.f32.mxu0 %vm2919_vm0, %v2920_v1  ;;  %2463 = vmatprep.mubr.msk.f32.mxu1 %vm2919_vm0, %v2920_v1 }
 0x53b   : > { %2459 = vmatmul.mubr.msk.f32.vlgmr.msra.gmra.mrb[6].mxu0 %vm1281_vm3, %v1648_v12  ;;  %2464 = vmatmul.mubr.msk.f32.vlgmr.msra.gmra.mrb[12].mxu1 %vm1281_vm3, %v1649_v61 }
 0x53c   : > { %2495 = vmatprep.subr.bf16.mxu0 %v2918_v0  ;;  %2474 = vmatprep.mubr.msk.f32.mxu0 %vm2919_vm0, %v2920_v1 }
 0x53d   : > { %2497 = vmatpush3.bf16.msra.mxu0 %v2496_v7 }
 0x53e   : > { %2498 = vmatprep.subr.bf16.mxu0 %v2918_v0 }
 0x541   : > { %2500 = vmatpush3.bf16.msra.mxu0 %v2499_v44 }
 0x60a   : > { %v1719_v13 = vpop.f32.mrb[4].mxu0  ;;  %v1792_v14 = vpop.f32.mrb[10].mxu1 }
 0x60b   : > { %v2450_v17 = vpop.f32.mrb[5].mxu0  ;;  %v2455_v20 = vpop.f32.mrb[11].mxu1 }
 0x60e   : > { %v1865_v8 = vpop.f32.mrb[6].mxu0  ;;  %v1938_v53 = vpop.f32.mrb[12].mxu1 }
 0x60f   : > { %v1942_v22 = vcombine.low %v1719_v13, %v1865_v8  ;;  %v1943_v15 = vcombine.high %v1719_v13, %v1865_v8  ;;  %v1958_v18 = vcombine.low %v1792_v14, %v1938_v53  ;;  %v1959_v23 = vcombine.high %v1792_v14, %v1938_v53  ;;  %v2460_v24 = vpop.f32.mrb[7].mxu0  ;;  %v2465_v25 = vpop.f32.mrb[13].mxu1 }
 0x611   : > { %v1950_v1 = vrot.slane %v1942_v22, %v3293_v32  ;;  %v1957_v26 = vrot.slane %v1943_v15, %v3293_v32  ;;  %v1966_v29 = vrot.slane %v1958_v18, %v3293_v32  ;;  %v1973_v0 = vrot.slane %v1959_v23, %v3293_v32 }
 0x613   : > { %v1974_v30 = vcombine.low %v1950_v1, %v1966_v29  ;;  %v1975_v31 = vcombine.high %v1950_v1, %v1966_v29  ;;  %v1990_v34 = vcombine.low %v1957_v26, %v1973_v0  ;;  %v1991_v36 = vcombine.high %v1957_v26, %v1973_v0 }
 0x615   : > { %v1982_v41 = vrot.slane %v1974_v30, %v3296_v39  ;;  %v1989_v42 = vrot.slane %v1975_v31, %v3296_v39  ;;  %v1998_v28 = vrot.slane %v1990_v34, %v3296_v39  ;;  %v2005_v43 = vrot.slane %v1991_v36, %v3296_v39 }
 0x617   : > { %v2010_v21 = vcombine.low %v1982_v41, %v1989_v42  ;;  %v2349_v63 = vcombine.high %v1982_v41, %v1989_v42  ;;  %v2026_v46 = vcombine.low %v1998_v28, %v2005_v43  ;;  %v2350_v47 = vcombine.high %v1998_v28, %v2005_v43 }
 0x619   : > { %v2017_v48 = vrot.slane %v2010_v21, %v3293_v32  ;;  %v2025_v50 = vrot.slane %v2349_v63, %v3293_v32  ;;  %v2033_v51 = vrot.slane %v2026_v46, %v3293_v32  ;;  %v2041_v56 = vrot.slane %v2350_v47, %v3293_v32 }
 0x61b   : > { %v2043_v57 = vcombine.high %v2017_v48, %v2025_v50  ;;  %v2059_v58 = vcombine.high %v2033_v51, %v2041_v56  ;;  %v2042_v16 = vcombine.low %v2017_v48, %v2025_v50  ;;  %v2058_v59 = vcombine.low %v2033_v51, %v2041_v56 }
 0x61d   : > { %v2057_v60 = vrot.slane %v2043_v57, %v3296_v39  ;;  %v2073_v19 = vrot.slane %v2059_v58, %v3296_v39  ;;  %v2050_v5 = vrot.slane %v2042_v16, %v3296_v39  ;;  %v2066_v33 = vrot.slane %v2058_v59, %v3296_v39 }
 0x61f   : > { %v2076_v40 = vcombine.low %v2057_v60, %v2073_v19  ;;  %v2075_v2 = vcombine.high %v2050_v5, %v2066_v33  ;;  %v2077_v27 = vcombine.high %v2057_v60, %v2073_v19  ;;  %v2074_v35 = vcombine.low %v2050_v5, %v2066_v33 }
 0x621   : > { %2083 = vrot.lane.b32.xlu1 %v2076_v40, %s2927_s30  ;;  %2079 = vrot.lane.b32.xlu0 %v2075_v2, %s2928_s17  ;;  %s3572_s30 = scalar_lea.hbm %s3652_s9, %s2354_s27  ;;  %s2181_s17 = scalar_lea.sflag [#allocation4], %s3229_s1 }
 0x625   : > { %2087 = vrot.lane.b32.xlu0 %v2077_v27, %s2929_s21  ;;  %s2834_s21 = sshll.u32 %s2930_s12, 4  ;;  %s2835_s21 = int_to_ptr.vmem [resolvable:$false] %s2834_s21 }
 0x626   : > { %s2836_s20 = scalar_lea.vmem %s2835_s21, 256  ;;  %p2837_p13 = scmp.lt.s32.totalorder %s3574_s23, %s2835_s21 }
 0x627   : > { %p2838_p0 = scmp.lt.s32.totalorder %s2836_s20, %s2830_s19 }
 0x629   : > { %p2839_p2 = por %p2838_p0, %p2837_p13 }
 0x62b   : > { %p2840_p3 = pnand %p2839_p2, %p2833_p1 }
 0x693   : > { %v2080_v32 = vpop.permute.xlu0 %2079  ;;  %v2084_v3 = vpop.permute.xlu1 %2083 }
 0x694   : > { %v2090_v45 = vsel %vm1281_vm3, %v2074_v35, %v2080_v32 }
 0x695   : > { %v2092_v54 = vsel %vm2091_vm4, %v2090_v45, %v2084_v3 }
 0x697   : > { %v2088_v39 = vpop.permute.xlu0 %2087 }
 0x698   : > { %v2094_v4 = vsel %vm2093_vm5, %v2092_v54, %v2088_v39 }
 0x699   : > { %2475 = vmatmul.mubr.msk.f32.vlgmr.msra.gmra.mrb[8].mxu0 %vm460_vm1, %v2094_v4 }
 0x76c   : > { %v2175_v49 = vpop.f32.mrb[8].mxu0 }
 0x76d   : > { %v2176_v52 = vadd.f32 %v2351_v55, %v2175_v49  ;;  %v2476_v9 = vpop.f32.mrb[9].mxu0 }
 0x76f   : > { %2179 = vst.msk [vmem:[%s447_s25] sm:$0xff] %vm460_vm1, %v2176_v52 }
 0x770   : > { %2843 = shalt.err (!%p2840_p3)
}
 0x771   : > { %s2844_s1 = scalar_lea.hbm %s3572_s30, 128  ;;  %s2848_s27 = scalar_lea.hbm %s3652_s9, 256 }
 0x772   : > { %p2845_p6 = scmp.ne.s32.totalorder %s3572_s30, %s2844_s1  ;;  %p2849_p8 = scmp.lt.u32.totalorder %s3572_s30, %s3652_s9 }
 0x773   : > { %p2850_p5 = scmp.lt.u32.totalorder %s2848_s27, %s2844_s1  ;;  %p2852_p7 = scmp.lt.u32.totalorder %s2844_s1, %s3572_s30 }
 0x774   : > { %p2846_p10 = pnand %p2845_p6, %p3653_p4 }
 0x775   : > { %p2851_p9 = por %p2850_p5, %p2849_p8 }
 0x776   : > { %p2847_p11 = pneg %p2846_p10 }
 0x777   : > { %p2853_p12 = por %p2852_p7, %p2851_p9 }
 0x779   : > { %p2854_p1 = pnand %p2853_p12, %p2847_p11 }
 0x77b   : > { %2857 = shalt.err (!%p2854_p1)
}
 0x77c   : > { %2523 = dma.vmem_to_hbm [thread:$0]  (%p3653_p4), %s3574_s23, 128, %s3572_s30, %s2181_s17  }
 0x77d PF: > { %s2206_s18 = sand.u32 1, %s2896_s13   ;;  %p3654_p13 = scmp.ne.s32.totalorder %s3642_s29, 0 }
 0x77e   : > { %p3655_p0 = scmp.ge.s32.totalorder %s2908_s16, 2  ;;  %s2207_s19 = scalar_lea.sflag [#allocation4], %s2206_s18 }
 0x780   : > { %p2546_p2 = pnand %p3655_p0, %p3654_p13 }
 0x782   : > { %2891 = dma.done.wait (!%p2546_p2), %s2207_s19, 128  }
 0x783   : > { %2893 = vsyncadd (!%p2546_p2), %s2207_s19, 4294967168  ;;  %p26_p3 = scmp.ge.s32.totalorder %s3159_s11, 4   ;;  %s3656_s13 = smov %s2900_s14 }
 0x784   : > { %s3657_s14 = smov %s2904_s15  ;;  %s3658_s15 = smov %s3171_s10 }
 0x785   : > { %s3659_s16 = smov %s3159_s11  ;;  %28 = sbr.rel (!%p26_p3) target bundleno = 12 (0xc), region = 125 }
 0x78c   :  { %2212 = vsyncpa [#allocation3], 1 }
 0x78d   :  { %2214 = vsyncpa [#allocation3 + $0x1], 1 }
 0x78e   :  { %2215 = vsyncpa [#allocation6], 1 }
 0x78f   :  { %2216 = vsyncpa [#allocation9], 1 }
 0x790   :  { %2217 = vsyncpa [#allocation12], 1 }
 0x791   :  { %2218 = vsyncpa [#allocation4], 1 }
 0x792   :  { %2220 = vsyncpa [#allocation4 + $0x1], 1 }

</bundles_post_ra>
